<compile_context>
chip_gen: v6e
topology: v6e:2x2x1
jax: 0.10.0
libtpu: 0.0.40
codegen_flags: <defaults>
</compile_context>

<pallas_src>
import numpy as np
from math import exp

import jax
import jax.numpy as jnp
from jax import lax
from jax.experimental import pallas as pl
from jax.experimental.pallas import tpu as pltpu


def _gaussian_1d(window_size: int = 11, sigma: float = 1.5) -> np.ndarray:
    """Matches SSIM.gaussian(): f32 normalized 1D gaussian."""
    g = np.array(
        [exp(-((x - window_size // 2) ** 2) / float(2 * sigma ** 2))
         for x in range(window_size)],
        dtype=np.float32,
    )
    return (g / g.sum()).astype(np.float32)


def _make_ssim_kernel(H, Hp, Wcat, Wout, S, ws, g1d, need_col_mask):
    C1 = 0.01 ** 2
    C2 = 0.03 ** 2
    taps = [float(v) for v in g1d]

    def kernel(x_ref, y_ref, band_ref, mask_ref, out_ref):
        x = x_ref[...]                       # (S, Hp, Wcat) f32, zero-padded
        y = y_ref[...]
        band = band_ref[...]                 # (Wcat, Wout) banded gaussian

        # Vertical (sublane) 11-tap pass on the VPU, pairwise tree-add.
        def vconv(a):                        # (S, Hp, Wcat) -> (S, H, Wcat)
            terms = [taps[d] * a[:, d:d + H, :] for d in range(ws)]
            while len(terms) > 1:
                nxt = [terms[i] + terms[i + 1]
                       for i in range(0, len(terms) - 1, 2)]
                if len(terms) % 2:
                    nxt.append(terms[-1])
                terms = nxt
            return terms[0]

        # Full separable conv for one quantity; horizontal pass on the MXU.
        def conv2(q):                        # (S, Hp, Wcat) -> (S*H, Wout)
            v = vconv(q).reshape(S * H, Wcat)
            return jnp.dot(v, band,
                           preferred_element_type=jnp.float32,
                           precision=lax.Precision.HIGHEST)

        # Stream the five quantities (keeps the live VMEM set small).
        mu1 = conv2(x)
        mu2 = conv2(y)
        s11 = conv2(x * x)
        s22 = conv2(y * y)
        s12 = conv2(x * y)

        mu1_sq = mu1 * mu1
        mu2_sq = mu2 * mu2
        mu1_mu2 = mu1 * mu2
        sigma1_sq = s11 - mu1_sq
        sigma2_sq = s22 - mu2_sq
        sigma12 = s12 - mu1_mu2

        num = (2.0 * mu1_mu2 + C1) * (2.0 * sigma12 + C2)
        den = (mu1_sq + mu2_sq + C1) * (sigma1_sq + sigma2_sq + C2)
        # Exact reciprocal (not approx) to stay close to the PyTorch reference.
        ssim_map = num * pl.reciprocal(den, approx=False)

        if need_col_mask:
            # Zero the inter-plane pad columns of the lane-folded layout.
            ssim_map = ssim_map * mask_ref[...]

        partial = jnp.sum(ssim_map)
        # Lane-dense, unmasked store of this step's partial sum.
        out_ref[...] = jnp.broadcast_to(partial, (1, 8, 128)).astype(jnp.float32)

    return kernel


def ssim(img1: jax.Array, img2: jax.Array,
         window_size: int = 11, size_average: bool = True) -> jax.Array:
    """Forward of the PyTorch SSIM module (size_average=True path)."""
    assert img1.shape == img2.shape
    N, C, H, W = img1.shape
    ws = window_size
    pad = ws // 2
    Hp, Wp = H + 2 * pad, W + 2 * pad
    NC = N * C
    g1d = _gaussian_1d(ws, 1.5)

    # Lane folding: pack L zero-padded planes side-by-side along the lane axis
    # (padding columns isolate neighbouring planes for the 11-tap window).
    L = max(1, min(NC, 128 // Wp)) if Wp < 128 else 1
    Wcat = L * Wp
    Wout = Wcat - (ws - 1)
    n_groups = -(-NC // L)                      # ceil

    # Generation-aware VMEM sizing: ~half of physical, capped at 64 MiB
    # (=> 64 MiB scoped on v5e/v6e, 32 MiB on v7x's 64 MiB VMEM).
    try:
        vmem_cap = int(pltpu.get_tpu_info().vmem_capacity_bytes)
    except Exception:
        vmem_cap = 64 * 1024 * 1024
    vmem_limit = min(vmem_cap // 2, 64 * 1024 * 1024)
    budget_elems = (vmem_limit // 2) // 4       # live f32 elems per grid step

    # Groups per grid step: bounded by the VMEM budget (~16 slabs of
    # Hp x Wcat f32 live per group in the streamed kernel, incl. the
    # double-buffered inputs), and capped so the grid has >= 4 steps when
    # possible (DMA overlap everywhere, both TensorCores busy on v7x).
    per_group = 16 * Hp * Wcat
    s_budget = max(1, budget_elems // per_group)
    target_steps = min(n_groups, 4)
    s_cap = -(-n_groups // target_steps)
    S = max(1, min(n_groups, s_budget, s_cap))
    if H % 8 != 0:
        S = 1   # keep the in-kernel (S*H, Wcat) reshape layout-trivial
    G = -(-n_groups // S)                       # grid size
    NP = G * S * L                              # planes incl. zero dummies

    def prep(a):
        a = a.astype(jnp.float32).reshape(NC, H, W)
        # Zero-pad spatially (matches F.conv2d padding) and up to NP planes.
        a = jnp.pad(a, ((0, NP - NC), (pad, pad), (pad, pad)))
        # Lane-fold: (G*S, L, Hp, Wp) -> (G*S, Hp, L*Wp).
        a = a.reshape(G * S, L, Hp, Wp).transpose(0, 2, 1, 3)
        return a.reshape(G * S, Hp, Wcat)

    x = prep(img1)
    y = prep(img2)

    # Banded Gaussian matrix for the horizontal (lane) conv on the MXU:
    # out[:, j] = sum_d g[d] * in[:, j + d]  <=>  band[j + d, j] = g[d].
    band_np = np.zeros((Wcat, Wout), dtype=np.float32)
    for j in range(Wout):
        band_np[j:j + ws, j] = g1d
    band = jnp.asarray(band_np)

    # {0,1} mask over output columns: real pixels vs inter-plane pad columns.
    cols = np.arange(Wout)
    colmask = jnp.asarray(((cols % Wp) < W).astype(np.float32).reshape(1, Wout))
    need_col_mask = L > 1

    kernel = _make_ssim_kernel(H, Hp, Wcat, Wout, S, ws, g1d, need_col_mask)

    partials = pl.pallas_call(
        kernel,
        out_shape=jax.ShapeDtypeStruct((G, 8, 128), jnp.float32),
        grid_spec=pltpu.PrefetchScalarGridSpec(
            num_scalar_prefetch=0,
            grid=(G,),
            in_specs=[
                pl.BlockSpec((S, Hp, Wcat), lambda i: (i, 0, 0)),
                pl.BlockSpec((S, Hp, Wcat), lambda i: (i, 0, 0)),
                pl.BlockSpec((Wcat, Wout), lambda i: (0, 0)),
                pl.BlockSpec((1, Wout), lambda i: (0, 0)),
            ],
            out_specs=pl.BlockSpec((1, 8, 128), lambda i: (i, 0, 0)),
        ),
        compiler_params=pltpu.CompilerParams(
            dimension_semantics=("parallel",),
            vmem_limit_bytes=vmem_limit,
        ),
    )(x, y, band, colmask)

    total = jnp.sum(partials[:, 0, 0])
    # Zero-filled dummy planes (plane padding up to NP) each contribute
    # ssim == 1 over their H*W valid pixels; subtract that known constant
    # instead of masking per-element inside the kernel.
    total = total - jnp.float32((NP - NC) * H * W)

    if not size_average:
        # TODO(synk): per-image mean (size_average=False) not implemented.
        raise NotImplementedError("size_average=False not implemented")
    return total / jnp.float32(N * C * H * W)


if __name__ == "__main__":
    key = jax.random.PRNGKey(0)
    k1, k2 = jax.random.split(key)
    img1 = jax.random.uniform(k1, (2, 4, 16, 16), dtype=jnp.float32)
    img2 = jax.random.uniform(k2, (2, 4, 16, 16), dtype=jnp.float32)

    out = ssim(img1, img2)
    jax.block_until_ready(out)
    print("KERNEL_OK")
</pallas_src>

<mosaic_0001>
module attributes {stable_mosaic.version = 11 : i64} {
  func.func @kernel(%arg0: i32, %arg1: memref<1x26x104xf32, #tpu.memory_space<vmem>>, %arg2: memref<1x26x104xf32, #tpu.memory_space<vmem>>, %arg3: memref<104x94xf32, #tpu.memory_space<vmem>>, %arg4: memref<1x94xf32, #tpu.memory_space<vmem>>, %arg5: memref<1x8x128xf32, #tpu.memory_space<vmem>>) attributes {dimension_semantics = [#tpu.dimension_semantics<parallel>], iteration_bounds = array<i64: 2>, scalar_prefetch = 0 : i64, scratch_operands = 0 : i64, tpu.core_type = #tpu.core_type<tc>, window_params = [{transform_indices = @transform_0, window_bounds = array<i64: 1, 26, 104>}, {transform_indices = @transform_1, window_bounds = array<i64: 1, 26, 104>}, {pipeline_mode = #tpu.pipeline_mode<synchronous>, transform_indices = @transform_2, window_bounds = array<i64: 104, 94>}, {pipeline_mode = #tpu.pipeline_mode<synchronous>, transform_indices = @transform_3, window_bounds = array<i64: 1, 94>}, {transform_indices = @transform_4, window_bounds = array<i64: 1, 8, 128>}]} {
    %c0 = arith.constant 0 : index
    %c0_0 = arith.constant 0 : index
    %c0_1 = arith.constant 0 : index
    %0 = vector.load %arg1[%c0, %c0_0, %c0_1] : memref<1x26x104xf32, #tpu.memory_space<vmem>>, vector<1x26x104xf32>
    %c0_2 = arith.constant 0 : index
    %c0_3 = arith.constant 0 : index
    %c0_4 = arith.constant 0 : index
    %1 = vector.load %arg2[%c0_2, %c0_3, %c0_4] : memref<1x26x104xf32, #tpu.memory_space<vmem>>, vector<1x26x104xf32>
    %c0_5 = arith.constant 0 : index
    %c0_6 = arith.constant 0 : index
    %2 = vector.load %arg3[%c0_5, %c0_6] : memref<104x94xf32, #tpu.memory_space<vmem>>, vector<104x94xf32>
    %3 = vector.extract_strided_slice %0 {offsets = [0, 0, 0], sizes = [1, 16, 104], strides = [1, 1, 1]} : vector<1x26x104xf32> to vector<1x16x104xf32>
    %cst = arith.constant 0.00102838024 : f32
    %4 = vector.broadcast %cst : f32 to vector<1x16x104xf32>
    %5 = arith.mulf %4, %3 : vector<1x16x104xf32>
    %6 = vector.extract_strided_slice %0 {offsets = [0, 1, 0], sizes = [1, 16, 104], strides = [1, 1, 1]} : vector<1x26x104xf32> to vector<1x16x104xf32>
    %cst_7 = arith.constant 0.00759875868 : f32
    %7 = vector.broadcast %cst_7 : f32 to vector<1x16x104xf32>
    %8 = arith.mulf %7, %6 : vector<1x16x104xf32>
    %9 = vector.extract_strided_slice %0 {offsets = [0, 2, 0], sizes = [1, 16, 104], strides = [1, 1, 1]} : vector<1x26x104xf32> to vector<1x16x104xf32>
    %cst_8 = arith.constant 0.0360007733 : f32
    %10 = vector.broadcast %cst_8 : f32 to vector<1x16x104xf32>
    %11 = arith.mulf %10, %9 : vector<1x16x104xf32>
    %12 = vector.extract_strided_slice %0 {offsets = [0, 3, 0], sizes = [1, 16, 104], strides = [1, 1, 1]} : vector<1x26x104xf32> to vector<1x16x104xf32>
    %cst_9 = arith.constant 0.109360695 : f32
    %13 = vector.broadcast %cst_9 : f32 to vector<1x16x104xf32>
    %14 = arith.mulf %13, %12 : vector<1x16x104xf32>
    %15 = vector.extract_strided_slice %0 {offsets = [0, 4, 0], sizes = [1, 16, 104], strides = [1, 1, 1]} : vector<1x26x104xf32> to vector<1x16x104xf32>
    %cst_10 = arith.constant 0.213005543 : f32
    %16 = vector.broadcast %cst_10 : f32 to vector<1x16x104xf32>
    %17 = arith.mulf %16, %15 : vector<1x16x104xf32>
    %18 = vector.extract_strided_slice %0 {offsets = [0, 5, 0], sizes = [1, 16, 104], strides = [1, 1, 1]} : vector<1x26x104xf32> to vector<1x16x104xf32>
    %cst_11 = arith.constant 0.266011745 : f32
    %19 = vector.broadcast %cst_11 : f32 to vector<1x16x104xf32>
    %20 = arith.mulf %19, %18 : vector<1x16x104xf32>
    %21 = vector.extract_strided_slice %0 {offsets = [0, 6, 0], sizes = [1, 16, 104], strides = [1, 1, 1]} : vector<1x26x104xf32> to vector<1x16x104xf32>
    %cst_12 = arith.constant 0.213005543 : f32
    %22 = vector.broadcast %cst_12 : f32 to vector<1x16x104xf32>
    %23 = arith.mulf %22, %21 : vector<1x16x104xf32>
    %24 = vector.extract_strided_slice %0 {offsets = [0, 7, 0], sizes = [1, 16, 104], strides = [1, 1, 1]} : vector<1x26x104xf32> to vector<1x16x104xf32>
    %cst_13 = arith.constant 0.109360695 : f32
    %25 = vector.broadcast %cst_13 : f32 to vector<1x16x104xf32>
    %26 = arith.mulf %25, %24 : vector<1x16x104xf32>
    %27 = vector.extract_strided_slice %0 {offsets = [0, 8, 0], sizes = [1, 16, 104], strides = [1, 1, 1]} : vector<1x26x104xf32> to vector<1x16x104xf32>
    %cst_14 = arith.constant 0.0360007733 : f32
    %28 = vector.broadcast %cst_14 : f32 to vector<1x16x104xf32>
    %29 = arith.mulf %28, %27 : vector<1x16x104xf32>
    %30 = vector.extract_strided_slice %0 {offsets = [0, 9, 0], sizes = [1, 16, 104], strides = [1, 1, 1]} : vector<1x26x104xf32> to vector<1x16x104xf32>
    %cst_15 = arith.constant 0.00759875868 : f32
    %31 = vector.broadcast %cst_15 : f32 to vector<1x16x104xf32>
    %32 = arith.mulf %31, %30 : vector<1x16x104xf32>
    %33 = vector.extract_strided_slice %0 {offsets = [0, 10, 0], sizes = [1, 16, 104], strides = [1, 1, 1]} : vector<1x26x104xf32> to vector<1x16x104xf32>
    %cst_16 = arith.constant 0.00102838024 : f32
    %34 = vector.broadcast %cst_16 : f32 to vector<1x16x104xf32>
    %35 = arith.mulf %34, %33 : vector<1x16x104xf32>
    %36 = arith.addf %5, %8 : vector<1x16x104xf32>
    %37 = arith.addf %11, %14 : vector<1x16x104xf32>
    %38 = arith.addf %17, %20 : vector<1x16x104xf32>
    %39 = arith.addf %23, %26 : vector<1x16x104xf32>
    %40 = arith.addf %29, %32 : vector<1x16x104xf32>
    %41 = arith.addf %36, %37 : vector<1x16x104xf32>
    %42 = arith.addf %38, %39 : vector<1x16x104xf32>
    %43 = arith.addf %40, %35 : vector<1x16x104xf32>
    %44 = arith.addf %41, %42 : vector<1x16x104xf32>
    %45 = arith.addf %44, %43 : vector<1x16x104xf32>
    %46 = vector.shape_cast %45 : vector<1x16x104xf32> to vector<16x104xf32>
    %cst_17 = arith.constant dense<0.000000e+00> : vector<16x94xf32>
    %47 = tpu.matmul %46, %2, %cst_17 {dimension_numbers = #tpu.dot_dimension_numbers<[1], [0], [0], [1], [0, 0, 1, 1], [], []>, precision = #tpu.contract_precision<fp32>} : vector<16x104xf32>, vector<104x94xf32>, vector<16x94xf32> -> vector<16x94xf32>
    %48 = vector.extract_strided_slice %1 {offsets = [0, 0, 0], sizes = [1, 16, 104], strides = [1, 1, 1]} : vector<1x26x104xf32> to vector<1x16x104xf32>
    %cst_18 = arith.constant 0.00102838024 : f32
    %49 = vector.broadcast %cst_18 : f32 to vector<1x16x104xf32>
    %50 = arith.mulf %49, %48 : vector<1x16x104xf32>
    %51 = vector.extract_strided_slice %1 {offsets = [0, 1, 0], sizes = [1, 16, 104], strides = [1, 1, 1]} : vector<1x26x104xf32> to vector<1x16x104xf32>
    %cst_19 = arith.constant 0.00759875868 : f32
    %52 = vector.broadcast %cst_19 : f32 to vector<1x16x104xf32>
    %53 = arith.mulf %52, %51 : vector<1x16x104xf32>
    %54 = vector.extract_strided_slice %1 {offsets = [0, 2, 0], sizes = [1, 16, 104], strides = [1, 1, 1]} : vector<1x26x104xf32> to vector<1x16x104xf32>
    %cst_20 = arith.constant 0.0360007733 : f32
    %55 = vector.broadcast %cst_20 : f32 to vector<1x16x104xf32>
    %56 = arith.mulf %55, %54 : vector<1x16x104xf32>
    %57 = vector.extract_strided_slice %1 {offsets = [0, 3, 0], sizes = [1, 16, 104], strides = [1, 1, 1]} : vector<1x26x104xf32> to vector<1x16x104xf32>
    %cst_21 = arith.constant 0.109360695 : f32
    %58 = vector.broadcast %cst_21 : f32 to vector<1x16x104xf32>
    %59 = arith.mulf %58, %57 : vector<1x16x104xf32>
    %60 = vector.extract_strided_slice %1 {offsets = [0, 4, 0], sizes = [1, 16, 104], strides = [1, 1, 1]} : vector<1x26x104xf32> to vector<1x16x104xf32>
    %cst_22 = arith.constant 0.213005543 : f32
    %61 = vector.broadcast %cst_22 : f32 to vector<1x16x104xf32>
    %62 = arith.mulf %61, %60 : vector<1x16x104xf32>
    %63 = vector.extract_strided_slice %1 {offsets = [0, 5, 0], sizes = [1, 16, 104], strides = [1, 1, 1]} : vector<1x26x104xf32> to vector<1x16x104xf32>
    %cst_23 = arith.constant 0.266011745 : f32
    %64 = vector.broadcast %cst_23 : f32 to vector<1x16x104xf32>
    %65 = arith.mulf %64, %63 : vector<1x16x104xf32>
    %66 = vector.extract_strided_slice %1 {offsets = [0, 6, 0], sizes = [1, 16, 104], strides = [1, 1, 1]} : vector<1x26x104xf32> to vector<1x16x104xf32>
    %cst_24 = arith.constant 0.213005543 : f32
    %67 = vector.broadcast %cst_24 : f32 to vector<1x16x104xf32>
    %68 = arith.mulf %67, %66 : vector<1x16x104xf32>
    %69 = vector.extract_strided_slice %1 {offsets = [0, 7, 0], sizes = [1, 16, 104], strides = [1, 1, 1]} : vector<1x26x104xf32> to vector<1x16x104xf32>
    %cst_25 = arith.constant 0.109360695 : f32
    %70 = vector.broadcast %cst_25 : f32 to vector<1x16x104xf32>
    %71 = arith.mulf %70, %69 : vector<1x16x104xf32>
    %72 = vector.extract_strided_slice %1 {offsets = [0, 8, 0], sizes = [1, 16, 104], strides = [1, 1, 1]} : vector<1x26x104xf32> to vector<1x16x104xf32>
    %cst_26 = arith.constant 0.0360007733 : f32
    %73 = vector.broadcast %cst_26 : f32 to vector<1x16x104xf32>
    %74 = arith.mulf %73, %72 : vector<1x16x104xf32>
    %75 = vector.extract_strided_slice %1 {offsets = [0, 9, 0], sizes = [1, 16, 104], strides = [1, 1, 1]} : vector<1x26x104xf32> to vector<1x16x104xf32>
    %cst_27 = arith.constant 0.00759875868 : f32
    %76 = vector.broadcast %cst_27 : f32 to vector<1x16x104xf32>
    %77 = arith.mulf %76, %75 : vector<1x16x104xf32>
    %78 = vector.extract_strided_slice %1 {offsets = [0, 10, 0], sizes = [1, 16, 104], strides = [1, 1, 1]} : vector<1x26x104xf32> to vector<1x16x104xf32>
    %cst_28 = arith.constant 0.00102838024 : f32
    %79 = vector.broadcast %cst_28 : f32 to vector<1x16x104xf32>
    %80 = arith.mulf %79, %78 : vector<1x16x104xf32>
    %81 = arith.addf %50, %53 : vector<1x16x104xf32>
    %82 = arith.addf %56, %59 : vector<1x16x104xf32>
    %83 = arith.addf %62, %65 : vector<1x16x104xf32>
    %84 = arith.addf %68, %71 : vector<1x16x104xf32>
    %85 = arith.addf %74, %77 : vector<1x16x104xf32>
    %86 = arith.addf %81, %82 : vector<1x16x104xf32>
    %87 = arith.addf %83, %84 : vector<1x16x104xf32>
    %88 = arith.addf %85, %80 : vector<1x16x104xf32>
    %89 = arith.addf %86, %87 : vector<1x16x104xf32>
    %90 = arith.addf %89, %88 : vector<1x16x104xf32>
    %91 = vector.shape_cast %90 : vector<1x16x104xf32> to vector<16x104xf32>
    %cst_29 = arith.constant dense<0.000000e+00> : vector<16x94xf32>
    %92 = tpu.matmul %91, %2, %cst_29 {dimension_numbers = #tpu.dot_dimension_numbers<[1], [0], [0], [1], [0, 0, 1, 1], [], []>, precision = #tpu.contract_precision<fp32>} : vector<16x104xf32>, vector<104x94xf32>, vector<16x94xf32> -> vector<16x94xf32>
    %93 = arith.mulf %0, %0 : vector<1x26x104xf32>
    %94 = vector.extract_strided_slice %93 {offsets = [0, 0, 0], sizes = [1, 16, 104], strides = [1, 1, 1]} : vector<1x26x104xf32> to vector<1x16x104xf32>
    %cst_30 = arith.constant 0.00102838024 : f32
    %95 = vector.broadcast %cst_30 : f32 to vector<1x16x104xf32>
    %96 = arith.mulf %95, %94 : vector<1x16x104xf32>
    %97 = vector.extract_strided_slice %93 {offsets = [0, 1, 0], sizes = [1, 16, 104], strides = [1, 1, 1]} : vector<1x26x104xf32> to vector<1x16x104xf32>
    %cst_31 = arith.constant 0.00759875868 : f32
    %98 = vector.broadcast %cst_31 : f32 to vector<1x16x104xf32>
    %99 = arith.mulf %98, %97 : vector<1x16x104xf32>
    %100 = vector.extract_strided_slice %93 {offsets = [0, 2, 0], sizes = [1, 16, 104], strides = [1, 1, 1]} : vector<1x26x104xf32> to vector<1x16x104xf32>
    %cst_32 = arith.constant 0.0360007733 : f32
    %101 = vector.broadcast %cst_32 : f32 to vector<1x16x104xf32>
    %102 = arith.mulf %101, %100 : vector<1x16x104xf32>
    %103 = vector.extract_strided_slice %93 {offsets = [0, 3, 0], sizes = [1, 16, 104], strides = [1, 1, 1]} : vector<1x26x104xf32> to vector<1x16x104xf32>
    %cst_33 = arith.constant 0.109360695 : f32
    %104 = vector.broadcast %cst_33 : f32 to vector<1x16x104xf32>
    %105 = arith.mulf %104, %103 : vector<1x16x104xf32>
    %106 = vector.extract_strided_slice %93 {offsets = [0, 4, 0], sizes = [1, 16, 104], strides = [1, 1, 1]} : vector<1x26x104xf32> to vector<1x16x104xf32>
    %cst_34 = arith.constant 0.213005543 : f32
    %107 = vector.broadcast %cst_34 : f32 to vector<1x16x104xf32>
    %108 = arith.mulf %107, %106 : vector<1x16x104xf32>
    %109 = vector.extract_strided_slice %93 {offsets = [0, 5, 0], sizes = [1, 16, 104], strides = [1, 1, 1]} : vector<1x26x104xf32> to vector<1x16x104xf32>
    %cst_35 = arith.constant 0.266011745 : f32
    %110 = vector.broadcast %cst_35 : f32 to vector<1x16x104xf32>
    %111 = arith.mulf %110, %109 : vector<1x16x104xf32>
    %112 = vector.extract_strided_slice %93 {offsets = [0, 6, 0], sizes = [1, 16, 104], strides = [1, 1, 1]} : vector<1x26x104xf32> to vector<1x16x104xf32>
    %cst_36 = arith.constant 0.213005543 : f32
    %113 = vector.broadcast %cst_36 : f32 to vector<1x16x104xf32>
    %114 = arith.mulf %113, %112 : vector<1x16x104xf32>
    %115 = vector.extract_strided_slice %93 {offsets = [0, 7, 0], sizes = [1, 16, 104], strides = [1, 1, 1]} : vector<1x26x104xf32> to vector<1x16x104xf32>
    %cst_37 = arith.constant 0.109360695 : f32
    %116 = vector.broadcast %cst_37 : f32 to vector<1x16x104xf32>
    %117 = arith.mulf %116, %115 : vector<1x16x104xf32>
    %118 = vector.extract_strided_slice %93 {offsets = [0, 8, 0], sizes = [1, 16, 104], strides = [1, 1, 1]} : vector<1x26x104xf32> to vector<1x16x104xf32>
    %cst_38 = arith.constant 0.0360007733 : f32
    %119 = vector.broadcast %cst_38 : f32 to vector<1x16x104xf32>
    %120 = arith.mulf %119, %118 : vector<1x16x104xf32>
    %121 = vector.extract_strided_slice %93 {offsets = [0, 9, 0], sizes = [1, 16, 104], strides = [1, 1, 1]} : vector<1x26x104xf32> to vector<1x16x104xf32>
    %cst_39 = arith.constant 0.00759875868 : f32
    %122 = vector.broadcast %cst_39 : f32 to vector<1x16x104xf32>
    %123 = arith.mulf %122, %121 : vector<1x16x104xf32>
    %124 = vector.extract_strided_slice %93 {offsets = [0, 10, 0], sizes = [1, 16, 104], strides = [1, 1, 1]} : vector<1x26x104xf32> to vector<1x16x104xf32>
    %cst_40 = arith.constant 0.00102838024 : f32
    %125 = vector.broadcast %cst_40 : f32 to vector<1x16x104xf32>
    %126 = arith.mulf %125, %124 : vector<1x16x104xf32>
    %127 = arith.addf %96, %99 : vector<1x16x104xf32>
    %128 = arith.addf %102, %105 : vector<1x16x104xf32>
    %129 = arith.addf %108, %111 : vector<1x16x104xf32>
    %130 = arith.addf %114, %117 : vector<1x16x104xf32>
    %131 = arith.addf %120, %123 : vector<1x16x104xf32>
    %132 = arith.addf %127, %128 : vector<1x16x104xf32>
    %133 = arith.addf %129, %130 : vector<1x16x104xf32>
    %134 = arith.addf %131, %126 : vector<1x16x104xf32>
    %135 = arith.addf %132, %133 : vector<1x16x104xf32>
    %136 = arith.addf %135, %134 : vector<1x16x104xf32>
    %137 = vector.shape_cast %136 : vector<1x16x104xf32> to vector<16x104xf32>
    %cst_41 = arith.constant dense<0.000000e+00> : vector<16x94xf32>
    %138 = tpu.matmul %137, %2, %cst_41 {dimension_numbers = #tpu.dot_dimension_numbers<[1], [0], [0], [1], [0, 0, 1, 1], [], []>, precision = #tpu.contract_precision<fp32>} : vector<16x104xf32>, vector<104x94xf32>, vector<16x94xf32> -> vector<16x94xf32>
    %139 = arith.mulf %1, %1 : vector<1x26x104xf32>
    %140 = vector.extract_strided_slice %139 {offsets = [0, 0, 0], sizes = [1, 16, 104], strides = [1, 1, 1]} : vector<1x26x104xf32> to vector<1x16x104xf32>
    %cst_42 = arith.constant 0.00102838024 : f32
    %141 = vector.broadcast %cst_42 : f32 to vector<1x16x104xf32>
    %142 = arith.mulf %141, %140 : vector<1x16x104xf32>
    %143 = vector.extract_strided_slice %139 {offsets = [0, 1, 0], sizes = [1, 16, 104], strides = [1, 1, 1]} : vector<1x26x104xf32> to vector<1x16x104xf32>
    %cst_43 = arith.constant 0.00759875868 : f32
    %144 = vector.broadcast %cst_43 : f32 to vector<1x16x104xf32>
    %145 = arith.mulf %144, %143 : vector<1x16x104xf32>
    %146 = vector.extract_strided_slice %139 {offsets = [0, 2, 0], sizes = [1, 16, 104], strides = [1, 1, 1]} : vector<1x26x104xf32> to vector<1x16x104xf32>
    %cst_44 = arith.constant 0.0360007733 : f32
    %147 = vector.broadcast %cst_44 : f32 to vector<1x16x104xf32>
    %148 = arith.mulf %147, %146 : vector<1x16x104xf32>
    %149 = vector.extract_strided_slice %139 {offsets = [0, 3, 0], sizes = [1, 16, 104], strides = [1, 1, 1]} : vector<1x26x104xf32> to vector<1x16x104xf32>
    %cst_45 = arith.constant 0.109360695 : f32
    %150 = vector.broadcast %cst_45 : f32 to vector<1x16x104xf32>
    %151 = arith.mulf %150, %149 : vector<1x16x104xf32>
    %152 = vector.extract_strided_slice %139 {offsets = [0, 4, 0], sizes = [1, 16, 104], strides = [1, 1, 1]} : vector<1x26x104xf32> to vector<1x16x104xf32>
    %cst_46 = arith.constant 0.213005543 : f32
    %153 = vector.broadcast %cst_46 : f32 to vector<1x16x104xf32>
    %154 = arith.mulf %153, %152 : vector<1x16x104xf32>
    %155 = vector.extract_strided_slice %139 {offsets = [0, 5, 0], sizes = [1, 16, 104], strides = [1, 1, 1]} : vector<1x26x104xf32> to vector<1x16x104xf32>
    %cst_47 = arith.constant 0.266011745 : f32
    %156 = vector.broadcast %cst_47 : f32 to vector<1x16x104xf32>
    %157 = arith.mulf %156, %155 : vector<1x16x104xf32>
    %158 = vector.extract_strided_slice %139 {offsets = [0, 6, 0], sizes = [1, 16, 104], strides = [1, 1, 1]} : vector<1x26x104xf32> to vector<1x16x104xf32>
    %cst_48 = arith.constant 0.213005543 : f32
    %159 = vector.broadcast %cst_48 : f32 to vector<1x16x104xf32>
    %160 = arith.mulf %159, %158 : vector<1x16x104xf32>
    %161 = vector.extract_strided_slice %139 {offsets = [0, 7, 0], sizes = [1, 16, 104], strides = [1, 1, 1]} : vector<1x26x104xf32> to vector<1x16x104xf32>
    %cst_49 = arith.constant 0.109360695 : f32
    %162 = vector.broadcast %cst_49 : f32 to vector<1x16x104xf32>
    %163 = arith.mulf %162, %161 : vector<1x16x104xf32>
    %164 = vector.extract_strided_slice %139 {offsets = [0, 8, 0], sizes = [1, 16, 104], strides = [1, 1, 1]} : vector<1x26x104xf32> to vector<1x16x104xf32>
    %cst_50 = arith.constant 0.0360007733 : f32
    %165 = vector.broadcast %cst_50 : f32 to vector<1x16x104xf32>
    %166 = arith.mulf %165, %164 : vector<1x16x104xf32>
    %167 = vector.extract_strided_slice %139 {offsets = [0, 9, 0], sizes = [1, 16, 104], strides = [1, 1, 1]} : vector<1x26x104xf32> to vector<1x16x104xf32>
    %cst_51 = arith.constant 0.00759875868 : f32
    %168 = vector.broadcast %cst_51 : f32 to vector<1x16x104xf32>
    %169 = arith.mulf %168, %167 : vector<1x16x104xf32>
    %170 = vector.extract_strided_slice %139 {offsets = [0, 10, 0], sizes = [1, 16, 104], strides = [1, 1, 1]} : vector<1x26x104xf32> to vector<1x16x104xf32>
    %cst_52 = arith.constant 0.00102838024 : f32
    %171 = vector.broadcast %cst_52 : f32 to vector<1x16x104xf32>
    %172 = arith.mulf %171, %170 : vector<1x16x104xf32>
    %173 = arith.addf %142, %145 : vector<1x16x104xf32>
    %174 = arith.addf %148, %151 : vector<1x16x104xf32>
    %175 = arith.addf %154, %157 : vector<1x16x104xf32>
    %176 = arith.addf %160, %163 : vector<1x16x104xf32>
    %177 = arith.addf %166, %169 : vector<1x16x104xf32>
    %178 = arith.addf %173, %174 : vector<1x16x104xf32>
    %179 = arith.addf %175, %176 : vector<1x16x104xf32>
    %180 = arith.addf %177, %172 : vector<1x16x104xf32>
    %181 = arith.addf %178, %179 : vector<1x16x104xf32>
    %182 = arith.addf %181, %180 : vector<1x16x104xf32>
    %183 = vector.shape_cast %182 : vector<1x16x104xf32> to vector<16x104xf32>
    %cst_53 = arith.constant dense<0.000000e+00> : vector<16x94xf32>
    %184 = tpu.matmul %183, %2, %cst_53 {dimension_numbers = #tpu.dot_dimension_numbers<[1], [0], [0], [1], [0, 0, 1, 1], [], []>, precision = #tpu.contract_precision<fp32>} : vector<16x104xf32>, vector<104x94xf32>, vector<16x94xf32> -> vector<16x94xf32>
    %185 = arith.mulf %0, %1 : vector<1x26x104xf32>
    %186 = vector.extract_strided_slice %185 {offsets = [0, 0, 0], sizes = [1, 16, 104], strides = [1, 1, 1]} : vector<1x26x104xf32> to vector<1x16x104xf32>
    %cst_54 = arith.constant 0.00102838024 : f32
    %187 = vector.broadcast %cst_54 : f32 to vector<1x16x104xf32>
    %188 = arith.mulf %187, %186 : vector<1x16x104xf32>
    %189 = vector.extract_strided_slice %185 {offsets = [0, 1, 0], sizes = [1, 16, 104], strides = [1, 1, 1]} : vector<1x26x104xf32> to vector<1x16x104xf32>
    %cst_55 = arith.constant 0.00759875868 : f32
    %190 = vector.broadcast %cst_55 : f32 to vector<1x16x104xf32>
    %191 = arith.mulf %190, %189 : vector<1x16x104xf32>
    %192 = vector.extract_strided_slice %185 {offsets = [0, 2, 0], sizes = [1, 16, 104], strides = [1, 1, 1]} : vector<1x26x104xf32> to vector<1x16x104xf32>
    %cst_56 = arith.constant 0.0360007733 : f32
    %193 = vector.broadcast %cst_56 : f32 to vector<1x16x104xf32>
    %194 = arith.mulf %193, %192 : vector<1x16x104xf32>
    %195 = vector.extract_strided_slice %185 {offsets = [0, 3, 0], sizes = [1, 16, 104], strides = [1, 1, 1]} : vector<1x26x104xf32> to vector<1x16x104xf32>
    %cst_57 = arith.constant 0.109360695 : f32
    %196 = vector.broadcast %cst_57 : f32 to vector<1x16x104xf32>
    %197 = arith.mulf %196, %195 : vector<1x16x104xf32>
    %198 = vector.extract_strided_slice %185 {offsets = [0, 4, 0], sizes = [1, 16, 104], strides = [1, 1, 1]} : vector<1x26x104xf32> to vector<1x16x104xf32>
    %cst_58 = arith.constant 0.213005543 : f32
    %199 = vector.broadcast %cst_58 : f32 to vector<1x16x104xf32>
    %200 = arith.mulf %199, %198 : vector<1x16x104xf32>
    %201 = vector.extract_strided_slice %185 {offsets = [0, 5, 0], sizes = [1, 16, 104], strides = [1, 1, 1]} : vector<1x26x104xf32> to vector<1x16x104xf32>
    %cst_59 = arith.constant 0.266011745 : f32
    %202 = vector.broadcast %cst_59 : f32 to vector<1x16x104xf32>
    %203 = arith.mulf %202, %201 : vector<1x16x104xf32>
    %204 = vector.extract_strided_slice %185 {offsets = [0, 6, 0], sizes = [1, 16, 104], strides = [1, 1, 1]} : vector<1x26x104xf32> to vector<1x16x104xf32>
    %cst_60 = arith.constant 0.213005543 : f32
    %205 = vector.broadcast %cst_60 : f32 to vector<1x16x104xf32>
    %206 = arith.mulf %205, %204 : vector<1x16x104xf32>
    %207 = vector.extract_strided_slice %185 {offsets = [0, 7, 0], sizes = [1, 16, 104], strides = [1, 1, 1]} : vector<1x26x104xf32> to vector<1x16x104xf32>
    %cst_61 = arith.constant 0.109360695 : f32
    %208 = vector.broadcast %cst_61 : f32 to vector<1x16x104xf32>
    %209 = arith.mulf %208, %207 : vector<1x16x104xf32>
    %210 = vector.extract_strided_slice %185 {offsets = [0, 8, 0], sizes = [1, 16, 104], strides = [1, 1, 1]} : vector<1x26x104xf32> to vector<1x16x104xf32>
    %cst_62 = arith.constant 0.0360007733 : f32
    %211 = vector.broadcast %cst_62 : f32 to vector<1x16x104xf32>
    %212 = arith.mulf %211, %210 : vector<1x16x104xf32>
    %213 = vector.extract_strided_slice %185 {offsets = [0, 9, 0], sizes = [1, 16, 104], strides = [1, 1, 1]} : vector<1x26x104xf32> to vector<1x16x104xf32>
    %cst_63 = arith.constant 0.00759875868 : f32
    %214 = vector.broadcast %cst_63 : f32 to vector<1x16x104xf32>
    %215 = arith.mulf %214, %213 : vector<1x16x104xf32>
    %216 = vector.extract_strided_slice %185 {offsets = [0, 10, 0], sizes = [1, 16, 104], strides = [1, 1, 1]} : vector<1x26x104xf32> to vector<1x16x104xf32>
    %cst_64 = arith.constant 0.00102838024 : f32
    %217 = vector.broadcast %cst_64 : f32 to vector<1x16x104xf32>
    %218 = arith.mulf %217, %216 : vector<1x16x104xf32>
    %219 = arith.addf %188, %191 : vector<1x16x104xf32>
    %220 = arith.addf %194, %197 : vector<1x16x104xf32>
    %221 = arith.addf %200, %203 : vector<1x16x104xf32>
    %222 = arith.addf %206, %209 : vector<1x16x104xf32>
    %223 = arith.addf %212, %215 : vector<1x16x104xf32>
    %224 = arith.addf %219, %220 : vector<1x16x104xf32>
    %225 = arith.addf %221, %222 : vector<1x16x104xf32>
    %226 = arith.addf %223, %218 : vector<1x16x104xf32>
    %227 = arith.addf %224, %225 : vector<1x16x104xf32>
    %228 = arith.addf %227, %226 : vector<1x16x104xf32>
    %229 = vector.shape_cast %228 : vector<1x16x104xf32> to vector<16x104xf32>
    %cst_65 = arith.constant dense<0.000000e+00> : vector<16x94xf32>
    %230 = tpu.matmul %229, %2, %cst_65 {dimension_numbers = #tpu.dot_dimension_numbers<[1], [0], [0], [1], [0, 0, 1, 1], [], []>, precision = #tpu.contract_precision<fp32>} : vector<16x104xf32>, vector<104x94xf32>, vector<16x94xf32> -> vector<16x94xf32>
    %231 = arith.mulf %47, %47 : vector<16x94xf32>
    %232 = arith.mulf %92, %92 : vector<16x94xf32>
    %233 = arith.mulf %47, %92 : vector<16x94xf32>
    %234 = arith.subf %138, %231 : vector<16x94xf32>
    %235 = arith.subf %184, %232 : vector<16x94xf32>
    %236 = arith.subf %230, %233 : vector<16x94xf32>
    %cst_66 = arith.constant 2.000000e+00 : f32
    %237 = vector.broadcast %cst_66 : f32 to vector<16x94xf32>
    %238 = arith.mulf %237, %233 : vector<16x94xf32>
    %cst_67 = arith.constant 9.99999974E-5 : f32
    %239 = vector.broadcast %cst_67 : f32 to vector<16x94xf32>
    %240 = arith.addf %238, %239 : vector<16x94xf32>
    %cst_68 = arith.constant 2.000000e+00 : f32
    %241 = vector.broadcast %cst_68 : f32 to vector<16x94xf32>
    %242 = arith.mulf %241, %236 : vector<16x94xf32>
    %cst_69 = arith.constant 8.99999984E-4 : f32
    %243 = vector.broadcast %cst_69 : f32 to vector<16x94xf32>
    %244 = arith.addf %242, %243 : vector<16x94xf32>
    %245 = arith.mulf %240, %244 : vector<16x94xf32>
    %246 = arith.addf %231, %232 : vector<16x94xf32>
    %cst_70 = arith.constant 9.99999974E-5 : f32
    %247 = vector.broadcast %cst_70 : f32 to vector<16x94xf32>
    %248 = arith.addf %246, %247 : vector<16x94xf32>
    %249 = arith.addf %234, %235 : vector<16x94xf32>
    %cst_71 = arith.constant 8.99999984E-4 : f32
    %250 = vector.broadcast %cst_71 : f32 to vector<16x94xf32>
    %251 = arith.addf %249, %250 : vector<16x94xf32>
    %252 = arith.mulf %248, %251 : vector<16x94xf32>
    %253 = tpu.reciprocal %252 : vector<16x94xf32> -> vector<16x94xf32>
    %254 = arith.mulf %245, %253 : vector<16x94xf32>
    %c0_72 = arith.constant 0 : index
    %c0_73 = arith.constant 0 : index
    %255 = vector.load %arg4[%c0_72, %c0_73] : memref<1x94xf32, #tpu.memory_space<vmem>>, vector<1x94xf32>
    %256 = vector.broadcast %255 : vector<1x94xf32> to vector<16x94xf32>
    %257 = arith.mulf %254, %256 : vector<16x94xf32>
    %258 = vector.shape_cast %257 : vector<16x94xf32> to vector<1x16x94xf32>
    %cst_74 = arith.constant dense<0.000000e+00> : vector<1xf32>
    %259 = vector.multi_reduction <add>, %258, %cst_74 [1, 2] : vector<1x16x94xf32> to vector<1xf32>
    %260 = vector.shape_cast %259 : vector<1xf32> to vector<1x1x1xf32>
    %261 = vector.extract %260[0, 0, 0] : f32 from vector<1x1x1xf32>
    %262 = vector.broadcast %261 : f32 to vector<1x8x128xf32>
    %c0_75 = arith.constant 0 : index
    %c0_76 = arith.constant 0 : index
    %c0_77 = arith.constant 0 : index
    %263 = vector.load %arg5[%c0_75, %c0_76, %c0_77] : memref<1x8x128xf32, #tpu.memory_space<vmem>>, vector<1x8x128xf32>
    tpu.vector_store %arg5[%c0_75, %c0_76, %c0_77], %262 {strides = array<i32>} : memref<1x8x128xf32, #tpu.memory_space<vmem>>, vector<1x8x128xf32>,
    return
  }
  func.func @transform_0(%arg0: i32) -> (i32, i32, i32) {
    %c0_i32 = arith.constant 0 : i32
    %c0_i32_0 = arith.constant 0 : i32
    %c0_i32_1 = arith.constant 0 : i32
    return %arg0, %c0_i32, %c0_i32_0 : i32, i32, i32
  }
  func.func @transform_1(%arg0: i32) -> (i32, i32, i32) {
    %c0_i32 = arith.constant 0 : i32
    %c0_i32_0 = arith.constant 0 : i32
    %c0_i32_1 = arith.constant 0 : i32
    return %arg0, %c0_i32, %c0_i32_0 : i32, i32, i32
  }
  func.func @transform_2(%arg0: i32) -> (i32, i32) {
    %c0_i32 = arith.constant 0 : i32
    %c0_i32_0 = arith.constant 0 : i32
    %c0_i32_1 = arith.constant 0 : i32
    return %c0_i32, %c0_i32_0 : i32, i32
  }
  func.func @transform_3(%arg0: i32) -> (i32, i32) {
    %c0_i32 = arith.constant 0 : i32
    %c0_i32_0 = arith.constant 0 : i32
    %c0_i32_1 = arith.constant 0 : i32
    return %c0_i32, %c0_i32_0 : i32, i32
  }
  func.func @transform_4(%arg0: i32) -> (i32, i32, i32) {
    %c0_i32 = arith.constant 0 : i32
    %c0_i32_0 = arith.constant 0 : i32
    %c0_i32_1 = arith.constant 0 : i32
    return %arg0, %c0_i32, %c0_i32_0 : i32, i32, i32
  }
}

</mosaic_0001>

<bundles_post_ra>
// kernel: tpu_custom_call.1
= control target key start
LH: loop header
LB: loop body
LE: loop exit
PB: predicated region body
PF: predicated region fallthrough
CT: control target
= control target key end

     0   :  { %9 = vsyncpa [#allocation3], 0  ;;  %s7327_s0 = inlined_call_operand.vmem [shape: f32[2,26,104], index: 0, kind: input, shape index: {}]   ;;  %s7328_s1 = inlined_call_operand.vmem [shape: f32[2,26,104], index: 1, kind: input, shape index: {}]   ;;  %s7329_s2 = inlined_call_operand.vmem [shape: f32[104,94], index: 2, kind: input, shape index: {}]   ;;  %s7330_s3 = inlined_call_operand.vmem [shape: f32[1,94], index: 3, kind: input, shape index: {}]   ;;  %s7331_s4 = inlined_call_operand.hbm [shape: f32[2,8,128], index: 4, kind: output, shape index: {}]  }
   0x1   :  { %11 = vsyncpa [#allocation3 + $0x1], 0  ;;  %s5735_s15 = smov 0   ;;  %s5737_s16 = smov 0  }
   0x2   :  { %s5739_s17 = smov 0   ;;  %s5741_s18 = smov 0  }
   0x3 LB: > { %s5756_s19 = sadd.s32 4294967295, %s5707_s18   ;;  %s4258_s20 = sadd.s32 4294967294, %s5707_s18   ;;  %s5707_s18 = sphi %s5741_s18, %s7611_s18   ;;  %s5703_s17 = sphi %s5739_s17, %s7610_s17   ;;  %s5699_s16 = sphi %s5737_s16, %s7609_s16   ;;  %s5695_s15 = sphi %s5735_s15, %s7608_s15  }
   0x4   : > { %s5760_s21 = sadd.s32 1, %s5707_s18   ;;  %s118_s22 = sadd.s32 1, %s5703_s17 }
   0x5   : > { %s115_s23 = ssub.s32 %s5707_s18, %s5760_s21  ;;  %p128_p0 = scmp.ne.s32.totalorder %s5703_s17, %s5699_s16 }
   0x6   : > { %p116_p1 = scmp.eq.s32.totalorder %s115_s23, 0  ;;  %p129_p2 = scmp.eq.s32.totalorder %s5756_s19, 1 }
   0x7   : > { %p134_p3 = scmp.ne.s32.totalorder %s5699_s16, %s5695_s15  ;;  %p135_p4 = scmp.eq.s32.totalorder %s4258_s20, 1 }
   0x8   : > { %s5771_s24 = scalar_select %p116_p1, %s5703_s17, %s118_s22  }
   0x9   : > { %p5773_p5 = por %p129_p2, %p128_p0  ;;  %p5777_p6 = por %p135_p4, %p134_p3 }
   0xa   : > { %p4261_p7 = scmp.ge.s32.totalorder %s5707_s18, 1  ;;  %p175_p8 = scmp.lt.s32.totalorder %s5707_s18, 3 }
   0xc   : > { %p176_p9 = pnand %p4261_p7, %p175_p8 }
   0xe   : > { %179 = sbr.rel (%p176_p9) target bundleno = 890 (0x37a), region = 36 }
  0x13   : > { %v236_v0 = vld [vmem:[%s7329_s2 + $0x60] sm:$0xff]  ;;  %v235_v1 = vld [vmem:[%s7329_s2 + $0x58] sm:$0xff]  ;;  %v234_v2 = vld [vmem:[%s7329_s2 + $0x50] sm:$0xff]  ;;  %p206_p10 = scmp.lt.s32.totalorder %s5756_s19, 1  ;;  %vm260_vm0 = vcmask 1046528   ;;  %vm310_vm1 = vcmask 1045504  }
  0x14   : > { %v5793_v3 = vand.u32 4294901760, %v236_v0  ;;  %v5795_v4 = vand.u32 4294901760, %v235_v1  ;;  %v5797_v5 = vand.u32 4294901760, %v234_v2  ;;  %v233_v6 = vld [vmem:[%s7329_s2 + $0x48] sm:$0xff]  ;;  %v232_v7 = vld [vmem:[%s7329_s2 + $0x40] sm:$0xff]  ;;  %v231_v8 = vld [vmem:[%s7329_s2 + $0x38] sm:$0xff] }
  0x15   : > { %v5808_v9 = vand.u32 4294901760, %v233_v6  ;;  %v5810_v10 = vand.u32 4294901760, %v232_v7  ;;  %v5812_v11 = vand.u32 4294901760, %v231_v8  ;;  %v230_v12 = vld [vmem:[%s7329_s2 + $0x30] sm:$0xff]  ;;  %v229_v13 = vld [vmem:[%s7329_s2 + $0x28] sm:$0xff]  ;;  %s5835_s23 = scalar_select %p206_p10, %s5756_s19, 1 }
  0x16   : > { %4724 = vmatprep.subr.mxu0 %v5793_v3  ;;  %v5822_v14 = vsub.f32 %v236_v0, %v5793_v3  ;;  %v5825_v15 = vsub.f32 %v235_v1, %v5795_v4  ;;  %v5828_v16 = vsub.f32 %v234_v2, %v5797_v5  ;;  %v5830_v17 = vand.u32 4294901760, %v230_v12  ;;  %v228_v37 = vld [vmem:[%s7329_s2 + $0x20] sm:$0xff]  ;;  %v227_v38 = vld [vmem:[%s7329_s2 + $0x18] sm:$0xff]  ;;  %v226_v39 = vld [vmem:[%s7329_s2 + $0x10] sm:$0xff]  ;;  %s203_s29 = sand.u32 1, %s5699_s16   ;;  %s4269_s7 = sshll.u32 %s5756_s19, 7 }
  0x17   : > { %4725 = vmatpush3.msra.mxu0 %v5793_v3  ;;  %v5839_v18 = vsub.f32 %v233_v6, %v5808_v9  ;;  %v5842_v19 = vsub.f32 %v232_v7, %v5810_v10  ;;  %v5845_v20 = vsub.f32 %v231_v8, %v5812_v11  ;;  %v5847_v21 = vand.u32 4294901760, %v229_v13  ;;  %s4272_s27 = sshll.u32 %s5835_s23, 5  ;;  %v225_v43 = vld [vmem:[%s7329_s2 + $0x8] sm:$0xff]  ;;  %v224_v44 = vld [vmem:[%s7329_s2] sm:$0xff]  ;;  %s4262_s30 = sshll.u32 %s203_s29, 3 }
  0x18   : > { %7467 = vst [vmem:[#allocation5_spill] sm:$0xff] %v5822_v14  ;;  %7468 = vst [vmem:[#allocation6_spill] sm:$0xff] %v5825_v15  ;;  %v5850_v22 = vand.u32 4294901760, %v5822_v14  ;;  %4726 = vmatprep.subr.mxu0 %v5795_v4  ;;  %v5854_v23 = vand.u32 4294901760, %v5825_v15  ;;  %v5857_v24 = vand.u32 4294901760, %v5828_v16  ;;  %v5860_v25 = vsub.f32 %v230_v12, %v5830_v17  ;;  %s5926_s14 = scalar_lea.vmem %s7327_s0, %s4272_s27  ;;  %s6160_s28 = scalar_lea.vmem %s7328_s1, %s4272_s27 }
  0x19   : > { %7469 = vst [vmem:[#allocation7_spill] sm:$0xff] %v5828_v16  ;;  %7470 = vst [vmem:[#allocation8_spill] sm:$0xff] %v5839_v18  ;;  %4727 = vmatpush3.msra.mxu0 %v5795_v4  ;;  %v5864_v26 = vand.u32 4294901760, %v5839_v18  ;;  %v5867_v27 = vand.u32 4294901760, %v5842_v19  ;;  %v5870_v28 = vand.u32 4294901760, %v5845_v20  ;;  %v5873_v29 = vsub.f32 %v229_v13, %v5847_v21  ;;  %v5962_v59 = vld [vmem:[%s5926_s14] sm:$0xff]  ;;  %s4185_s11 = scalar_lea.hbm %s7331_s4, %s4269_s7 }
  0x1a   : > { %7471 = vst [vmem:[#allocation9_spill] sm:$0xff] %v5842_v19  ;;  %7472 = vst [vmem:[#allocation10_spill] sm:$0xff] %v5845_v20  ;;  %v476_v30 = vsub.f32 %v5822_v14, %v5850_v22  ;;  %v483_v31 = vsub.f32 %v5825_v15, %v5854_v23  ;;  %4728 = vmatprep.subr.mxu0 %v5797_v5  ;;  %v490_v32 = vsub.f32 %v5828_v16, %v5857_v24  ;;  %v5975_v63 = vld [vmem:[%s5926_s14 + $0x8] sm:$0xff]  ;;  %v5992_v7 = vld [vmem:[%s5926_s14 + $0x10] sm:$0xff]  ;;  %vm349_vm2 = vcmask 1043456   ;;  %s205_s5 = scalar_lea.vmem [#allocation2], %s4262_s30 }
  0x1b   : > { %7473 = vst [vmem:[#allocation11_spill] sm:$0xff] %v5850_v22  ;;  %7474 = vst [vmem:[#allocation12_spill] sm:$0xff] %v5854_v23  ;;  %v5883_v33 = vand.u32 4294901760, %v5860_v25  ;;  %4729 = vmatpush3.msra.mxu0 %v5797_v5  ;;  %v497_v34 = vsub.f32 %v5839_v18, %v5864_v26  ;;  %v504_v35 = vsub.f32 %v5842_v19, %v5867_v27  ;;  %v5892_v36 = vand.u32 4294901760, %v5873_v29  ;;  %s4187_s6 = sshll.u32 %s205_s5, 4  ;;  %s4174_s12 = scalar_lea.sflag [#allocation3], %s203_s29  ;;  %s7289_s6 = int_to_ptr.vmem [resolvable:$true] %s4187_s6 }
  0x1c   : > { %7475 = vst [vmem:[#allocation13_spill] sm:$0xff] %v5857_v24  ;;  %7476 = vst [vmem:[#allocation14_spill] sm:$0xff] %v5860_v25  ;;  %v5903_v40 = vand.u32 4294901760, %v476_v30  ;;  %v5905_v41 = vand.u32 4294901760, %v483_v31  ;;  %4730 = vmatprep.subr.mxu0 %v5808_v9  ;;  %v511_v42 = vsub.f32 %v5845_v20, %v5870_v28  ;;  %v5916_v45 = vand.u32 4294901760, %v490_v32  ;;  %s5647_s13 = scalar_lea.vmem %s7289_s6, 128 }
  0x1d   : > { %7477 = vst [vmem:[#allocation15_spill] sm:$0xff] %v5867_v27  ;;  %7478 = vst [vmem:[#allocation16_spill] sm:$0xff] %v5870_v28  ;;  %4731 = vmatpush3.msra.mxu0 %v5808_v9  ;;  %v518_v46 = vsub.f32 %v5860_v25, %v5883_v33  ;;  %v5929_v47 = vand.u32 4294901760, %v497_v34  ;;  %v5932_v48 = vand.u32 4294901760, %v228_v37  ;;  %v5934_v49 = vand.u32 4294901760, %v227_v38  ;;  %p5648_p11 = scmp.ne.s32.totalorder %s7289_s6, %s5647_s13 }
  0x1e   : > { %7479 = vst [vmem:[#allocation17_spill] sm:$0xff] %v5873_v29  ;;  %7480 = vst [vmem:[#allocation18_spill] sm:$0xff] %v5883_v33  ;;  %4753 = vmatprep.subr.mxu1 %v5903_v40  ;;  %4732 = vmatprep.subr.mxu0 %v5810_v10  ;;  %v5936_v50 = vand.u32 4294901760, %v226_v39  ;;  %v5939_v51 = vand.u32 4294901760, %v504_v35  ;;  %v525_v52 = vsub.f32 %v5873_v29, %v5892_v36  ;;  %v5944_v53 = vand.u32 4294901760, %v225_v43 }
  0x1f   : > { %7481 = vst [vmem:[#allocation19_spill] sm:$0xff] %v5892_v36  ;;  %7482 = vst [vmem:[#allocation20_spill] sm:$0xff] %v5903_v40  ;;  %4754 = vmatpush3.msra.mxu1 %v5903_v40  ;;  %4733 = vmatpush3.msra.mxu0 %v5810_v10  ;;  %v5946_v54 = vand.u32 4294901760, %v224_v44  ;;  %v5950_v55 = vand.u32 4294901760, %v511_v42  ;;  %v5953_v56 = vsub.f32 %v228_v37, %v5932_v48  ;;  %v5966_v60 = vand.u32 4294901760, %v518_v46  ;;  %p5649_p12 = pnand %p5648_p11, %p5773_p5 }
  0x20   : > { %7483 = vst [vmem:[#allocation21_spill] sm:$0xff] %v5905_v41  ;;  %7484 = vst [vmem:[#allocation22_spill] sm:$0xff] %v5916_v45  ;;  %4755 = vmatprep.subr.mxu1 %v5905_v41  ;;  %4734 = vmatprep.subr.mxu0 %v5812_v11  ;;  %v5956_v57 = vsub.f32 %v227_v38, %v5934_v49  ;;  %v5959_v58 = vsub.f32 %v226_v39, %v5936_v50  ;;  %v5978_v0 = vmul.f32 0.0010283802, %v5962_v59  ;;  %vm361_vm3 = vcmask 850944  }
  0x21   : > { %7485 = vst [vmem:[#allocation23_spill] sm:$0xff] %v5929_v47  ;;  %7486 = vst [vmem:[#allocation24_spill] sm:$0xff] %v5939_v51  ;;  %4756 = vmatpush3.msra.mxu1 %v5905_v41  ;;  %4735 = vmatpush3.msra.mxu0 %v5812_v11  ;;  %v5969_v61 = vsub.f32 %v225_v43, %v5944_v53  ;;  %v5972_v62 = vsub.f32 %v224_v44, %v5946_v54  ;;  %v5983_v1 = vand.u32 4294901760, %v5953_v56  ;;  %vm4158_vm4 = vcmask 769024   ;;  %p5650_p13 = pneg %p5649_p12 }
  0x22   : > { %7487 = vst [vmem:[#allocation25_spill] sm:$0xff] %v5950_v55  ;;  %7488 = vst [vmem:[#allocation26_spill] sm:$0xff] %v5953_v56  ;;  %4757 = vmatprep.subr.mxu1 %v5916_v45  ;;  %4736 = vmatprep.subr.mxu0 %v5830_v17  ;;  %v5986_v2 = vand.u32 4294901760, %v5956_v57  ;;  %v5989_v6 = vand.u32 4294901760, %v5959_v58  ;;  %v5995_v8 = vmul.f32 0.0010283802, %v5975_v63 }
  0x23   : > { %7489 = vst [vmem:[#allocation27_spill] sm:$0xff] %v5956_v57  ;;  %7490 = vst [vmem:[#allocation28_spill] sm:$0xff] %v5959_v58  ;;  %4758 = vmatpush3.msra.mxu1 %v5916_v45  ;;  %4737 = vmatpush3.msra.mxu0 %v5830_v17  ;;  %v5999_v12 = vand.u32 4294901760, %v525_v52  ;;  %v6002_v13 = vand.u32 4294901760, %v5969_v61  ;;  %v239_v30 = vmul.f32 0.0075987587, %v5962_v59  ;;  %v532_v32 = vsub.f32 %v5953_v56, %v5983_v1 }
  0x24   : > { %7491 = vst [vmem:[#allocation29_spill] sm:$0xff] %v5962_v59  ;;  %7492 = vst [vmem:[#allocation30_spill] sm:$0xff] %v5966_v60  ;;  %v240_v31 = vmul.f32 0.0075987587, %v5975_v63  ;;  %4759 = vmatprep.subr.mxu1 %v5929_v47  ;;  %4738 = vmatprep.subr.mxu0 %v5847_v21  ;;  %v539_v34 = vsub.f32 %v5956_v57, %v5986_v2  ;;  %v546_v35 = vsub.f32 %v5959_v58, %v5989_v6 }
  0x25   : > { %7493 = vst [vmem:[#allocation31_spill] sm:$0xff] %v5969_v61  ;;  %7494 = vst [vmem:[#allocation32_spill] sm:$0xff] %v5972_v62  ;;  %v6015_v37 = vand.u32 4294901760, %v5972_v62  ;;  %4760 = vmatpush3.msra.mxu1 %v5929_v47  ;;  %4739 = vmatpush3.msra.mxu0 %v5847_v21  ;;  %v6020_v38 = vmul.f32 0.0075987587, %v5992_v7  ;;  %v553_v43 = vsub.f32 %v5969_v61, %v6002_v13  ;;  %v6034_v47 = vand.u32 4294901760, %v532_v32 }
  0x26   : > { %7495 = vst [vmem:[#allocation33_spill] sm:$0xff] %v5975_v63  ;;  %7496 = vst [vmem:[#allocation34_spill] sm:$0xff] %v5983_v1  ;;  %v242_v39 = vmul.f32 0.036000773, %v5962_v59  ;;  %v6024_v42 = vmul.f32 0.036000773, %v5975_v63  ;;  %4761 = vmatprep.subr.mxu1 %v5939_v51  ;;  %4740 = vmatprep.subr.mxu0 %v5932_v48 }
  0x27   : > { %7497 = vst [vmem:[#allocation35_spill] sm:$0xff] %v5986_v2  ;;  %7498 = vst [vmem:[#allocation36_spill] sm:$0xff] %v5989_v6  ;;  %v245_v44 = vmul.f32 0.109360695, %v5962_v59  ;;  %v246_v46 = vmul.f32 0.109360695, %v5975_v63  ;;  %4762 = vmatpush3.msra.mxu1 %v5939_v51  ;;  %4741 = vmatpush3.msra.mxu0 %v5932_v48 }
  0x28   : > { %7499 = vst [vmem:[#allocation37_spill] sm:$0xff] %v5992_v7  ;;  %7500 = vst [vmem:[#allocation38_spill] sm:$0xff] %v5999_v12  ;;  %v247_v52 = vmul.f32 0.109360695, %v5992_v7  ;;  %v6037_v45 = vand.u32 4294901760, %v539_v34  ;;  %v6039_v41 = vand.u32 4294901760, %v546_v35  ;;  %4763 = vmatprep.subr.mxu1 %v5950_v55  ;;  %4742 = vmatprep.subr.mxu0 %v5934_v49 }
  0x29   : > { %7501 = vst [vmem:[#allocation39_spill] sm:$0xff] %v6002_v13  ;;  %7502 = vst [vmem:[#allocation40_spill] sm:$0xff] %v6015_v37  ;;  %v248_v40 = vmul.f32 0.21300554, %v5962_v59  ;;  %v560_v13 = vsub.f32 %v5972_v62, %v6015_v37  ;;  %v251_v6 = vmul.f32 0.26601174, %v5962_v59  ;;  %4764 = vmatpush3.msra.mxu1 %v5950_v55  ;;  %4743 = vmatpush3.msra.mxu0 %v5934_v49 }
  0x2a   : > { %7503 = vst [vmem:[#allocation41_spill] sm:$0xff] %v6034_v47  ;;  %7504 = vst [vmem:[#allocation42_spill] sm:$0xff] %v6037_v45  ;;  %v252_v32 = vmul.f32 0.26601174, %v5975_v63  ;;  %v6049_v51 = vmul.f32 0.26601174, %v5992_v7  ;;  %4765 = vmatprep.subr.mxu1 %v5966_v60  ;;  %4744 = vmatprep.subr.mxu0 %v5936_v50 }
  0x2b   : > { %7505 = vst [vmem:[#allocation43_spill] sm:$0xff] %v6039_v41  ;;  %v249_v34 = vmul.f32 0.21300554, %v5975_v63  ;;  %v261_v35 = vrot.slane %v239_v30, 1  ;;  %v262_v2 = vrot.slane %v240_v31, 1  ;;  %v7360_v1 = vrot.slane %v6020_v38, 1  ;;  %4766 = vmatpush3.msra.mxu1 %v5966_v60  ;;  %4745 = vmatpush3.msra.mxu0 %v5936_v50 }
  0x2c   : > { %v273_v59 = vrot.slane %v245_v44, 1  ;;  %v274_v37 = vrot.slane %v246_v46, 1  ;;  %v276_v36 = vrot.slane %v247_v52, 1  ;;  %v287_v33 = vrot.slane %v251_v6, 1  ;;  %4767 = vmatprep.subr.mxu1 %v5999_v12  ;;  %4746 = vmatprep.subr.mxu0 %v5944_v53 }
  0x2d   : > { %v263_v55 = vsel %vm260_vm0, %v261_v35, %v262_v2  ;;  %v265_v30 = vsel %vm260_vm0, %v262_v2, %v7360_v1  ;;  %v288_v31 = vrot.slane %v252_v32, 1  ;;  %v290_v63 = vrot.slane %v6049_v51, 1  ;;  %4768 = vmatpush3.msra.mxu1 %v5999_v12  ;;  %4747 = vmatpush3.msra.mxu0 %v5944_v53  ;;  %v6089_v12 = vld [vmem:[%s5926_s14 + $0x18] sm:$0x3] }
  0x2e   : > { %v250_v44 = vmul.f32 0.21300554, %v5992_v7  ;;  %v6068_v6 = vmul.f32 0.0010283802, %v5992_v7  ;;  %v268_v46 = vadd.f32 %v263_v55, %v5978_v0  ;;  %v275_v52 = vsel %vm260_vm0, %v273_v59, %v274_v37  ;;  %4769 = vmatprep.subr.mxu1 %v6034_v47  ;;  %4748 = vmatprep.subr.mxu0 %v5946_v54  ;;  %7508 = vst [vmem:[#allocation46_spill] sm:$0xff] %v6089_v12 }
  0x2f   : > { %v6073_v35 = vand.u32 4294901760, %v553_v43  ;;  %v277_v51 = vsel %vm260_vm0, %v274_v37, %v276_v36  ;;  %v281_v2 = vadd.f32 %v275_v52, %v242_v39  ;;  %v289_v32 = vsel %vm260_vm0, %v287_v33, %v288_v31  ;;  %4770 = vmatpush3.msra.mxu1 %v6034_v47  ;;  %4749 = vmatpush3.msra.mxu0 %v5946_v54 }
  0x30   : > { %v6080_v1 = vand.u32 4294901760, %v560_v13  ;;  %v269_v55 = vadd.f32 %v265_v30, %v5995_v8  ;;  %v282_v59 = vadd.f32 %v277_v51, %v6024_v42  ;;  %v291_v0 = vsel %vm260_vm0, %v288_v31, %v290_v63  ;;  %4771 = vmatprep.subr.mxu1 %v6037_v45  ;;  %4782 = vmatprep.subr.mxu0 %v5822_v14 }
  0x31   : > { %7506 = vst [vmem:[#allocation44_spill] sm:$0xff] %v6073_v35  ;;  %v298_v37 = vadd.f32 %v275_v52, %v248_v40  ;;  %v299_v39 = vadd.f32 %v277_v51, %v249_v34  ;;  %v311_v43 = vrot.slane %v281_v2, 2  ;;  %v337_v33 = vrot.slane %v5995_v8, 2  ;;  %4772 = vmatpush3.msra.mxu1 %v6037_v45 }
  0x32   : > { %7507 = vst [vmem:[#allocation45_spill] sm:$0xff] %v6080_v1  ;;  %v295_v13 = vadd.f32 %v289_v32, %v248_v40  ;;  %v300_v60 = vadd.f32 %v276_v36, %v250_v44  ;;  %v312_v28 = vrot.slane %v282_v59, 2  ;;  %v338_v27 = vrot.slane %v6068_v6, 2  ;;  %4773 = vmatprep.subr.mxu1 %v6039_v41 }
  0x33   : > { %v296_v31 = vadd.f32 %v291_v0, %v249_v34  ;;  %v323_v47 = vrot.slane %v298_v37, 2  ;;  %v324_v52 = vrot.slane %v299_v39, 2  ;;  %v244_v51 = vmul.f32 0.036000773, %v5992_v7  ;;  %4774 = vmatpush3.msra.mxu1 %v6039_v41 }
  0x34   : > { %v305_v8 = vadd.f32 %v265_v30, %v6024_v42  ;;  %v326_v2 = vrot.slane %v300_v60, 2  ;;  %v254_v40 = vmul.f32 0.0075987587, %v6089_v12  ;;  %v313_v6 = vsel %vm310_vm1, %v311_v43, %v312_v28  ;;  %4775 = vmatprep.subr.mxu1 %v6073_v35 }
  0x35   : > { %v325_v32 = vsel %vm310_vm1, %v323_v47, %v324_v52  ;;  %v256_v34 = vmul.f32 0.0010283802, %v6089_v12  ;;  %v283_v59 = vadd.f32 %v276_v36, %v244_v51  ;;  %v297_v39 = vadd.f32 %v290_v63, %v250_v44  ;;  %4776 = vmatpush3.msra.mxu1 %v6073_v35 }
  0x36   : > { %v327_v0 = vsel %vm310_vm1, %v324_v52, %v326_v2  ;;  %v331_v37 = vadd.f32 %v325_v32, %v295_v13  ;;  %v302_v42 = vrot.slane %v254_v40, 1  ;;  %v339_v30 = vsel %vm310_vm1, %v337_v33, %v338_v27  ;;  %4777 = vmatprep.subr.mxu1 %v6080_v1 }
  0x37   : > { %v332_v60 = vadd.f32 %v327_v0, %v296_v31  ;;  %v314_v7 = vrot.slane %v283_v59, 2  ;;  %v340_v41 = vrot.slane %v256_v34, 2  ;;  %v318_v47 = vadd.f32 %v313_v6, %v268_v46  ;;  %4778 = vmatpush3.msra.mxu1 %v6080_v1 }
  0x38   : > { %v350_v43 = vrot.slane %v331_v37, 4  ;;  %v7509_v36 = vrot.slane %v6020_v38, 1  ;;  %v333_v45 = vadd.f32 %v326_v2, %v297_v39  ;;  %v344_v33 = vadd.f32 %v339_v30, %v305_v8  ;;  %4811 = vmatprep.subr.mxu1 %v5793_v3  ;;  %v6177_v30 = vld [vmem:[%s6160_s28 + $0x10] sm:$0xff] }
  0x39   : > { %v351_v63 = vrot.slane %v332_v60, 4  ;;  %v315_v13 = vsel %vm310_vm1, %v312_v28, %v314_v7  ;;  %v341_v31 = vsel %vm310_vm1, %v338_v27, %v340_v41  ;;  %v6174_v60 = vld [vmem:[%s6160_s28 + $0x8] sm:$0xff] }
  0x3a   : > { %v303_v12 = vsel %vm260_vm0, %v7509_v36, %v302_v42  ;;  %v319_v52 = vadd.f32 %v315_v13, %v269_v55  ;;  %v353_v40 = vrot.slane %v333_v45, 4  ;;  %v6171_v42 = vld [vmem:[%s6160_s28] sm:$0xff]  ;;  %v1023_v36 = vmul.f32 0.109360695, %v6177_v30 }
  0x3b   : > { %v306_v44 = vadd.f32 %v303_v12, %v244_v51  ;;  %v352_v46 = vsel %vm349_vm2, %v350_v43, %v351_v63  ;;  %v1022_v43 = vmul.f32 0.109360695, %v6174_v60 }
  0x3c   : > { %v357_v38 = vadd.f32 %v352_v46, %v318_v47  ;;  %v354_v32 = vsel %vm349_vm2, %v351_v63, %v353_v40  ;;  %v1021_v47 = vmul.f32 0.109360695, %v6171_v42  ;;  %v6196_v13 = vrot.slane %v1023_v36, 1 }
  0x3d   : > { %v345_v6 = vadd.f32 %v341_v31, %v306_v44  ;;  %v358_v2 = vadd.f32 %v354_v32, %v319_v52  ;;  %v1049_v44 = vrot.slane %v1022_v43, 1  ;;  %v1024_v31 = vmul.f32 0.21300554, %v6171_v42 }
  0x3e   : > { %v359_v34 = vadd.f32 %v357_v38, %v344_v33  ;;  %v1048_v63 = vrot.slane %v1021_v47, 1  ;;  %v1027_v33 = vmul.f32 0.26601174, %v6171_v42  ;;  %v1028_v52 = vmul.f32 0.26601174, %v6174_v60 }
  0x3f   : > { %v360_v59 = vadd.f32 %v358_v2, %v345_v6  ;;  %v1025_v40 = vmul.f32 0.21300554, %v6174_v60  ;;  %v1026_v46 = vmul.f32 0.21300554, %v6177_v30  ;;  %v1029_v6 = vmul.f32 0.26601174, %v6177_v30 }
  0x40   : > { %v363_v12 = vsel %vm361_vm3, %v359_v34, 0  ;;  %v1050_v38 = vsel %vm260_vm0, %v1048_v63, %v1049_v44  ;;  %v1052_v32 = vsel %vm260_vm0, %v1049_v44, %v6196_v13  ;;  %v1062_v2 = vrot.slane %v1027_v33, 1 }
  0x41   : > { %v6118_v28 = vand.u32 4294901760, %v363_v12  ;;  %v366_v27 = vsel %vm361_vm3, %v360_v59, 0  ;;  %v1063_v34 = vrot.slane %v1028_v52, 1  ;;  %v1065_v59 = vrot.slane %v1029_v6, 1  ;;  %v223_v6 = vld [vmem:[%s6160_s28 + $0x18] sm:$0x3] }
  0x42   : > { %v6121_v41 = vand.u32 4294901760, %v366_v27  ;;  %v6248_v63 = vmul.f32 0.036000773, %v6177_v30 }
  0x43   : > { %v6124_v45 = vsub.f32 %v363_v12, %v6118_v28  ;;  %4779 = vmatprep.mubr.f32.mxu1 %v6118_v28  ;;  %v1073_v12 = vadd.f32 %v1050_v38, %v1024_v31  ;;  %v1066_v47 = vsel %vm260_vm0, %v1063_v34, %v1065_v59 }
  0x44   : > { %v6128_v7 = vsub.f32 %v366_v27, %v6121_v41  ;;  %4780 = vmatmul.mubr.f32.vlgmr.msra.gmra.mxu1 %v6121_v41  ;;  %v1074_v27 = vadd.f32 %v1052_v32, %v1025_v40 }
  0x45   : > { %v448_v55 = vand.u32 4294901760, %v6124_v45  ;;  %4812 = vmatpush3.msra.mxu1 %v5793_v3  ;;  %v1097_v43 = vrot.slane %v1073_v12, 2  ;;  %v1071_v12 = vadd.f32 %v1066_v47, %v1025_v40  ;;  %v1013_v40 = vmul.f32 0.0010283802, %v6171_v42 }
  0x46   : > { %v458_v51 = vand.u32 4294901760, %v6128_v7  ;;  %4813 = vmatprep.subr.mxu1 %v5795_v4  ;;  %v1098_v36 = vrot.slane %v1074_v27, 2 }
  0x47   : > { %v449_v8 = vsub.f32 %v6124_v45, %v448_v55  ;;  %4814 = vmatpush3.msra.mxu1 %v5795_v4  ;;  %4837 = vmatprep.mubr.f32.mxu1 %v448_v55  ;;  %v1015_v55 = vmul.f32 0.0075987587, %v6171_v42 }
  0x48   : > { %v459_v0 = vsub.f32 %v6128_v7, %v458_v51  ;;  %4815 = vmatprep.subr.mxu1 %v5797_v5 }
  0x49   : > { %v450_v37 = vand.u32 4294901760, %v449_v8  ;;  %4816 = vmatpush3.msra.mxu1 %v5797_v5  ;;  %v1018_v8 = vmul.f32 0.036000773, %v6171_v42  ;;  %v1036_v44 = vrot.slane %v1015_v55, 1 }
  0x4a   : > { %v460_v39 = vand.u32 4294901760, %v459_v0  ;;  %4817 = vmatprep.subr.mxu1 %v5808_v9  ;;  %v6235_v0 = vmul.f32 0.0075987587, %v6177_v30 }
  0x4b   : > { %4750 = vmatprep.mubr.f32.mxu0 %v450_v37  ;;  %4818 = vmatpush3.msra.mxu1 %v5808_v9  ;;  %v6238_v37 = vmul.f32 0.036000773, %v6174_v60  ;;  %v1056_v52 = vadd.f32 %v1050_v38, %v1018_v8  ;;  %v1030_v38 = vmul.f32 0.0075987587, %v223_v6  ;;  %v1031_v8 = vmul.f32 0.0010283802, %v6177_v30 }
  0x4c   : > { %4751 = vmatmul.mubr.f32.vlgmr.msra.gmra.mxu0 %v460_v39  ;;  %4819 = vmatprep.subr.mxu1 %v5810_v10  ;;  %v1064_v39 = vsel %vm260_vm0, %v1062_v2, %v1063_v34  ;;  %v1039_v27 = vrot.slane %v6235_v0, 1 }
  0x4d   : > { %4783 = vmatpush3.msra.mxu0 %v5822_v14  ;;  %4820 = vmatpush3.msra.mxu1 %v5810_v10  ;;  %v1057_v2 = vadd.f32 %v1052_v32, %v6238_v37  ;;  %v1070_v34 = vadd.f32 %v1064_v39, %v1024_v31  ;;  %v1058_v32 = vadd.f32 %v6196_v13, %v6248_v63  ;;  %v7510_v39 = vld [vmem:[#allocation15_spill] sm:$0xff]  ;;  %v1085_v47 = vrot.slane %v1056_v52, 2 }
  0x4e   : > { %4784 = vmatprep.subr.mxu0 %v5825_v15  ;;  %4821 = vmatprep.subr.mxu1 %v5812_v11  ;;  %v1072_v31 = vadd.f32 %v1065_v59, %v1026_v46  ;;  %v7511_v59 = vld [vmem:[#allocation16_spill] sm:$0xff]  ;;  %v1077_v30 = vrot.slane %v1030_v38, 1 }
  0x4f   : > { %4785 = vmatpush3.msra.mxu0 %v5825_v15  ;;  %4822 = vmatpush3.msra.mxu1 %v5812_v11 }
  0x50   : > { %4786 = vmatprep.subr.mxu0 %v5828_v16  ;;  %4823 = vmatprep.subr.mxu1 %v5830_v17  ;;  %v1078_v38 = vsel %vm260_vm0, %v1039_v27, %v1077_v30 }
  0x51   : > { %4787 = vmatpush3.msra.mxu0 %v5828_v16  ;;  %4824 = vmatpush3.msra.mxu1 %v5830_v17 }
  0x52   : > { %4788 = vmatprep.subr.mxu0 %v5839_v18  ;;  %4825 = vmatprep.subr.mxu1 %v5847_v21 }
  0x53   : > { %4789 = vmatpush3.msra.mxu0 %v5839_v18  ;;  %4826 = vmatpush3.msra.mxu1 %v5847_v21 }
  0x54   : > { %4790 = vmatprep.subr.mxu0 %v5842_v19  ;;  %4827 = vmatprep.subr.mxu1 %v5932_v48 }
  0x55   : > { %4791 = vmatpush3.msra.mxu0 %v5842_v19  ;;  %4828 = vmatpush3.msra.mxu1 %v5932_v48 }
  0x56   : > { %4792 = vmatprep.subr.mxu0 %v5845_v20  ;;  %4829 = vmatprep.subr.mxu1 %v5934_v49 }
  0x57   : > { %4793 = vmatpush3.msra.mxu0 %v5845_v20  ;;  %4830 = vmatpush3.msra.mxu1 %v5934_v49 }
  0x58   : > { %4794 = vmatprep.subr.mxu0 %v5860_v25  ;;  %4831 = vmatprep.subr.mxu1 %v5936_v50 }
  0x59   : > { %4795 = vmatpush3.msra.mxu0 %v5860_v25  ;;  %4832 = vmatpush3.msra.mxu1 %v5936_v50 }
  0x5a   : > { %4796 = vmatprep.subr.mxu0 %v5873_v29  ;;  %4833 = vmatprep.subr.mxu1 %v5944_v53 }
  0x5b   : > { %4797 = vmatpush3.msra.mxu0 %v5873_v29  ;;  %4834 = vmatpush3.msra.mxu1 %v5944_v53 }
  0x5c   : > { %4798 = vmatprep.subr.mxu0 %v5953_v56  ;;  %4835 = vmatprep.subr.mxu1 %v5946_v54 }
  0x5d   : > { %4799 = vmatpush3.msra.mxu0 %v5953_v56  ;;  %4808 = vmatprep.mubr.f32.mxu0 %v6124_v45  ;;  %v6223_v45 = vadd.f32 %v6196_v13, %v1026_v46 }
  0x5e   : > { %4800 = vmatprep.subr.mxu0 %v5956_v57  ;;  %4836 = vmatpush3.msra.mxu1 %v5946_v54 }
  0x5f   : > { %4801 = vmatpush3.msra.mxu0 %v5956_v57  ;;  %4869 = vmatprep.subr.mxu1 %v5793_v3 }
  0x60   : > { %4802 = vmatprep.subr.mxu0 %v5959_v58  ;;  %4838 = vmatmul.mubr.f32.vlgmr.msra.gmra.mxu1 %v458_v51  ;;  %v1016_v51 = vmul.f32 0.0075987587, %v6174_v60 }
  0x61   : > { %4803 = vmatpush3.msra.mxu0 %v5959_v58  ;;  %4870 = vmatpush3.msra.mxu1 %v5793_v3 }
  0x62   : > { %4804 = vmatprep.subr.mxu0 %v5969_v61  ;;  %4871 = vmatprep.subr.mxu1 %v5795_v4  ;;  %v1037_v33 = vrot.slane %v1016_v51, 1  ;;  %v1014_v51 = vmul.f32 0.0010283802, %v6174_v60  ;;  %v1032_v60 = vmul.f32 0.0010283802, %v223_v6  ;;  %v7513_v6 = vld [vmem:[#allocation19_spill] sm:$0xff] }
  0x63   : > { %4805 = vmatpush3.msra.mxu0 %v5969_v61  ;;  %4872 = vmatpush3.msra.mxu1 %v5795_v4 }
  0x64   : > { %4806 = vmatprep.subr.mxu0 %v5972_v62  ;;  %4873 = vmatprep.subr.mxu1 %v5797_v5  ;;  %v1038_v0 = vsel %vm260_vm0, %v1036_v44, %v1037_v33  ;;  %v1040_v42 = vsel %vm260_vm0, %v1037_v33, %v1039_v27  ;;  %v1081_v27 = vadd.f32 %v1078_v38, %v6248_v63 }
  0x65   : > { %4807 = vmatpush3.msra.mxu0 %v5972_v62  ;;  %4874 = vmatpush3.msra.mxu1 %v5797_v5  ;;  %v1043_v52 = vadd.f32 %v1038_v0, %v1013_v40 }
  0x66   : > { %4809 = vmatmul.mubr.f32.vlgmr.msra.gmra.mxu0 %v6128_v7  ;;  %4840 = vmatprep.subr.mxu0 %v5850_v22  ;;  %v1100_v7 = vrot.slane %v6223_v45, 2  ;;  %v1099_v45 = vsel %vm310_vm1, %v1097_v43, %v1098_v36  ;;  %v1086_v43 = vrot.slane %v1057_v2, 2  ;;  %v1111_v2 = vrot.slane %v1014_v51, 2 }
  0x67   : > { %4841 = vmatpush3.msra.mxu0 %v5850_v22  ;;  %4875 = vmatprep.subr.mxu1 %v5808_v9  ;;  %v1105_v13 = vadd.f32 %v1099_v45, %v1070_v34  ;;  %v7512_v34 = vld [vmem:[#allocation18_spill] sm:$0xff] }
  0x68   : > { %4842 = vmatprep.subr.mxu0 %v5854_v23  ;;  %4876 = vmatpush3.msra.mxu1 %v5808_v9  ;;  %v1101_v55 = vsel %vm310_vm1, %v1098_v36, %v1100_v7  ;;  %v1088_v36 = vrot.slane %v1058_v32, 2  ;;  %v1107_v44 = vadd.f32 %v1100_v7, %v1072_v31  ;;  %v1087_v33 = vsel %vm310_vm1, %v1085_v47, %v1086_v43  ;;  %v7514_v47 = vld [vmem:[#allocation34_spill] sm:$0xff] }
  0x69   : > { %4843 = vmatpush3.msra.mxu0 %v5854_v23  ;;  %4877 = vmatprep.subr.mxu1 %v5810_v10  ;;  %v1106_v46 = vadd.f32 %v1101_v55, %v1071_v12  ;;  %v1112_v12 = vrot.slane %v1031_v8, 2  ;;  %v1123_v45 = vrot.slane %v1105_v13, 4  ;;  %v1044_v7 = vadd.f32 %v1040_v42, %v1014_v51 }
  0x6a   : > { %4844 = vmatprep.subr.mxu0 %v5857_v24  ;;  %4878 = vmatpush3.msra.mxu1 %v5810_v10  ;;  %v1089_v32 = vsel %vm310_vm1, %v1086_v43, %v1088_v36  ;;  %v1114_v31 = vrot.slane %v1032_v60, 2  ;;  %v1126_v40 = vrot.slane %v1107_v44, 4  ;;  %v1080_v8 = vadd.f32 %v1040_v42, %v6238_v37  ;;  %v7516_v36 = vld [vmem:[#allocation36_spill] sm:$0xff] }
  0x6b   : > { %4845 = vmatpush3.msra.mxu0 %v5857_v24  ;;  %4879 = vmatprep.subr.mxu1 %v5812_v11  ;;  %v1124_v55 = vrot.slane %v1106_v46, 4  ;;  %v1092_v0 = vadd.f32 %v1087_v33, %v1043_v52  ;;  %v1113_v51 = vsel %vm310_vm1, %v1111_v2, %v1112_v12  ;;  %v1093_v43 = vadd.f32 %v1089_v32, %v1044_v7  ;;  %v7515_v46 = vld [vmem:[#allocation35_spill] sm:$0xff]  ;;  %v7518_v2 = vld [vmem:[#allocation20_spill] sm:$0xff]  ;;  %v7521_v7 = vld [vmem:[#allocation22_spill] sm:$0xff] }
  0x6c   : > { %4846 = vmatprep.subr.mxu0 %v5864_v26  ;;  %4880 = vmatpush3.msra.mxu1 %v5812_v11  ;;  %v1115_v37 = vsel %vm310_vm1, %v1112_v12, %v1114_v31  ;;  %v1118_v60 = vadd.f32 %v1113_v51, %v1080_v8  ;;  %v7517_v52 = vld [vmem:[#allocation39_spill] sm:$0xff]  ;;  %v7519_v12 = vld [vmem:[#allocation40_spill] sm:$0xff] }
  0x6d   : > { %4847 = vmatpush3.msra.mxu0 %v5864_v26  ;;  %4881 = vmatprep.subr.mxu1 %v5830_v17  ;;  %v1125_v13 = vsel %vm349_vm2, %v1123_v45, %v1124_v55  ;;  %v1127_v42 = vsel %vm349_vm2, %v1124_v55, %v1126_v40  ;;  %v1119_v63 = vadd.f32 %v1115_v37, %v1081_v27  ;;  %v7522_v32 = vld [vmem:[#allocation23_spill] sm:$0xff]  ;;  %v7523_v40 = vld [vmem:[#allocation24_spill] sm:$0xff] }
  0x6e   : > { %4848 = vmatprep.subr.mxu0 %v7510_v39  ;;  %4882 = vmatpush3.msra.mxu1 %v5830_v17  ;;  %v1130_v30 = vadd.f32 %v1125_v13, %v1092_v0  ;;  %v1131_v44 = vadd.f32 %v1127_v42, %v1093_v43  ;;  %v7524_v0 = vld [vmem:[#allocation25_spill] sm:$0xff]  ;;  %v7525_v13 = vld [vmem:[#allocation30_spill] sm:$0xff] }
  0x6f   : > { %4849 = vmatpush3.msra.mxu0 %v7510_v39  ;;  %4883 = vmatprep.subr.mxu1 %v5847_v21  ;;  %v7526_v43 = vld [vmem:[#allocation38_spill] sm:$0xff]  ;;  %v7527_v42 = vld [vmem:[#allocation41_spill] sm:$0xff] }
  0x70   : > { %4850 = vmatprep.subr.mxu0 %v7511_v59  ;;  %4884 = vmatpush3.msra.mxu1 %v5847_v21  ;;  %v1132_v33 = vadd.f32 %v1130_v30, %v1118_v60  ;;  %v1133_v45 = vadd.f32 %v1131_v44, %v1119_v63  ;;  %v7528_v30 = vld [vmem:[#allocation42_spill] sm:$0xff]  ;;  %v7529_v44 = vld [vmem:[#allocation43_spill] sm:$0xff] }
  0x71   : > { %4851 = vmatpush3.msra.mxu0 %v7511_v59  ;;  %4885 = vmatprep.subr.mxu1 %v5932_v48 }
  0x72   : > { %4852 = vmatprep.subr.mxu0 %v7512_v34  ;;  %4886 = vmatpush3.msra.mxu1 %v5932_v48  ;;  %v1135_v55 = vsel %vm361_vm3, %v1132_v33, 0  ;;  %v1138_v38 = vsel %vm361_vm3, %v1133_v45, 0 }
  0x73   : > { %4853 = vmatpush3.msra.mxu0 %v7512_v34  ;;  %4887 = vmatprep.subr.mxu1 %v5934_v49  ;;  %v6335_v31 = vand.u32 4294901760, %v1138_v38 }
  0x74   : > { %4854 = vmatprep.subr.mxu0 %v7513_v6  ;;  %4888 = vmatpush3.msra.mxu1 %v5934_v49 }
  0x75   : > { %4855 = vmatpush3.msra.mxu0 %v7513_v6  ;;  %4889 = vmatprep.subr.mxu1 %v5936_v50  ;;  %v6349_v51 = vsub.f32 %v1138_v38, %v6335_v31 }
  0x76   : > { %4856 = vmatprep.subr.mxu0 %v7514_v47  ;;  %4890 = vmatpush3.msra.mxu1 %v5936_v50 }
  0x77   : > { %4857 = vmatpush3.msra.mxu0 %v7514_v47  ;;  %4891 = vmatprep.subr.mxu1 %v5944_v53  ;;  %v7377_v37 = vand.u32 4294901760, %v6349_v51 }
  0x78   : > { %4858 = vmatprep.subr.mxu0 %v7515_v46  ;;  %4892 = vmatpush3.msra.mxu1 %v5944_v53 }
  0x79   : > { %4859 = vmatpush3.msra.mxu0 %v7515_v46  ;;  %4893 = vmatprep.subr.mxu1 %v5946_v54  ;;  %v1231_v63 = vsub.f32 %v6349_v51, %v7377_v37 }
  0x7a   : > { %4860 = vmatprep.subr.mxu0 %v7516_v36  ;;  %4866 = vmatprep.mubr.f32.mxu0 %v6118_v28 }
  0x7b   : > { %4861 = vmatpush3.msra.mxu0 %v7516_v36  ;;  %4894 = vmatpush3.msra.mxu1 %v5946_v54  ;;  %v1232_v45 = vand.u32 4294901760, %v1231_v63 }
  0x7c   : > { %4862 = vmatprep.subr.mxu0 %v7517_v52  ;;  %4895 = vmatprep.mubr.f32.mxu1 %v6118_v28  ;;  %v7520_v28 = vld [vmem:[#allocation21_spill] sm:$0xff] }
  0x7d   : > { %4863 = vmatpush3.msra.mxu0 %v7517_v52  ;;  %4927 = vmatprep.subr.mxu1 %v7518_v2 }
  0x7e   : > { %4864 = vmatprep.subr.mxu0 %v7519_v12  ;;  %4896 = vmatmul.mubr.f32.vlgmr.msra.gmra.mxu1 %v6121_v41 }
  0x7f   : > { %4865 = vmatpush3.msra.mxu0 %v7519_v12  ;;  %4928 = vmatpush3.msra.mxu1 %v7518_v2 }
  0x80   : > { %4867 = vmatmul.mubr.f32.vlgmr.msra.gmra.mxu0 %v6121_v41  ;;  %4898 = vmatprep.subr.mxu0 %v5793_v3  ;;  %v6329_v41 = vand.u32 4294901760, %v1135_v55 }
  0x81   : > { %4899 = vmatpush3.msra.mxu0 %v5793_v3  ;;  %4929 = vmatprep.subr.mxu1 %v7520_v28 }
  0x82   : > { %4900 = vmatprep.subr.mxu0 %v5795_v4  ;;  %4930 = vmatpush3.msra.mxu1 %v7520_v28  ;;  %v6342_v8 = vsub.f32 %v1135_v55, %v6329_v41  ;;  %v7530_v55 = vld [vmem:[#allocation29_spill] sm:$0xff] }
  0x83   : > { %4901 = vmatpush3.msra.mxu0 %v5795_v4  ;;  %4931 = vmatprep.subr.mxu1 %v7521_v7  ;;  %v6419_v38 = vmul.f32 %v7530_v55, %v7530_v55 }
  0x84   : > { %4902 = vmatprep.subr.mxu0 %v5797_v5  ;;  %4932 = vmatpush3.msra.mxu1 %v7521_v7  ;;  %v7378_v27 = vand.u32 4294901760, %v6342_v8 }
  0x85   : > { %4903 = vmatpush3.msra.mxu0 %v5797_v5  ;;  %4933 = vmatprep.subr.mxu1 %v7522_v32  ;;  %v1797_v55 = vmul.f32 0.109360695, %v6419_v38 }
  0x86   : > { %4904 = vmatprep.subr.mxu0 %v5808_v9  ;;  %4934 = vmatpush3.msra.mxu1 %v7522_v32  ;;  %v1221_v60 = vsub.f32 %v6342_v8, %v7378_v27 }
  0x87   : > { %4905 = vmatpush3.msra.mxu0 %v5808_v9  ;;  %4935 = vmatprep.subr.mxu1 %v7523_v40  ;;  %v1824_v37 = vrot.slane %v1797_v55, 1  ;;  %v1803_v55 = vmul.f32 0.26601174, %v6419_v38 }
  0x88   : > { %4906 = vmatprep.subr.mxu0 %v5810_v10  ;;  %4936 = vmatpush3.msra.mxu1 %v7523_v40  ;;  %v1222_v33 = vand.u32 4294901760, %v1221_v60  ;;  %v7531_v60 = vld [vmem:[#allocation33_spill] sm:$0xff] }
  0x89   : > { %4907 = vmatpush3.msra.mxu0 %v5810_v10  ;;  %4937 = vmatprep.subr.mxu1 %v7524_v0  ;;  %v6423_v63 = vmul.f32 %v7531_v60, %v7531_v60 }
  0x8a   : > { %4908 = vmatprep.subr.mxu0 %v5812_v11  ;;  %4938 = vmatpush3.msra.mxu1 %v7524_v0 }
  0x8b   : > { %4909 = vmatpush3.msra.mxu0 %v5812_v11  ;;  %4939 = vmatprep.subr.mxu1 %v7525_v13  ;;  %v1798_v60 = vmul.f32 0.109360695, %v6423_v63 }
  0x8c   : > { %4910 = vmatprep.subr.mxu0 %v5830_v17  ;;  %4940 = vmatpush3.msra.mxu1 %v7525_v13 }
  0x8d   : > { %4911 = vmatpush3.msra.mxu0 %v5830_v17  ;;  %4941 = vmatprep.subr.mxu1 %v7526_v43  ;;  %v1825_v27 = vrot.slane %v1798_v60, 1  ;;  %v1804_v60 = vmul.f32 0.26601174, %v6423_v63 }
  0x8e   : > { %4912 = vmatprep.subr.mxu0 %v5847_v21  ;;  %4942 = vmatpush3.msra.mxu1 %v7526_v43 }
  0x8f   : > { %4913 = vmatpush3.msra.mxu0 %v5847_v21  ;;  %4943 = vmatprep.subr.mxu1 %v7527_v42 }
  0x90   : > { %4914 = vmatprep.subr.mxu0 %v5932_v48  ;;  %4944 = vmatpush3.msra.mxu1 %v7527_v42 }
  0x91   : > { %4915 = vmatpush3.msra.mxu0 %v5932_v48  ;;  %4945 = vmatprep.subr.mxu1 %v7528_v30 }
  0x92   : > { %4916 = vmatprep.subr.mxu0 %v5934_v49  ;;  %4946 = vmatpush3.msra.mxu1 %v7528_v30 }
  0x93   : > { %4917 = vmatpush3.msra.mxu0 %v5934_v49  ;;  %4947 = vmatprep.subr.mxu1 %v7529_v44 }
  0x94   : > { %4918 = vmatprep.subr.mxu0 %v5936_v50  ;;  %4948 = vmatpush3.msra.mxu1 %v7529_v44 }
  0x95   : > { %4919 = vmatpush3.msra.mxu0 %v5936_v50  ;;  %4949 = vmatprep.subr.mxu1 %v6073_v35 }
  0x96   : > { %4920 = vmatprep.subr.mxu0 %v5944_v53  ;;  %4950 = vmatpush3.msra.mxu1 %v6073_v35 }
  0x97   : > { %4921 = vmatpush3.msra.mxu0 %v5944_v53  ;;  %4951 = vmatprep.subr.mxu1 %v6080_v1 }
  0x98   : > { %4922 = vmatprep.subr.mxu0 %v5946_v54  ;;  %4924 = vmatprep.mubr.f32.mxu0 %v1222_v33  ;;  %v7532_v33 = vld [vmem:[#allocation37_spill] sm:$0xff] }
  0x99   : > { %4923 = vmatpush3.msra.mxu0 %v5946_v54  ;;  %4952 = vmatpush3.msra.mxu1 %v6080_v1  ;;  %v7535_v1 = vld [vmem:[#allocation46_spill] sm:$0xff] }
  0x9a   : > { %4953 = vmatprep.mubr.f32.mxu1 %v6329_v41  ;;  %4925 = vmatmul.mubr.f32.vlgmr.msra.gmra.mxu0 %v1232_v45  ;;  %v6427_v45 = vmul.f32 %v7532_v33, %v7532_v33  ;;  %v1788_v35 = vmul.f32 %v7535_v1, %v7535_v1 }
  0x9b   : > { %4954 = vmatmul.mubr.f32.vlgmr.msra.gmra.mxu1 %v6335_v31  ;;  %4956 = vmatprep.subr.mxu0 %v5822_v14 }
  0x9c   : > { %4985 = vmatprep.subr.mxu1 %v5793_v3  ;;  %4957 = vmatpush3.msra.mxu0 %v5822_v14  ;;  %v1799_v33 = vmul.f32 0.109360695, %v6427_v45  ;;  %v6500_v44 = vmul.f32 0.036000773, %v6427_v45 }
  0x9d   : > { %4986 = vmatpush3.msra.mxu1 %v5793_v3  ;;  %4958 = vmatprep.subr.mxu0 %v5825_v15 }
  0x9e   : > { %4987 = vmatprep.subr.mxu1 %v5795_v4  ;;  %4959 = vmatpush3.msra.mxu0 %v5825_v15 }
  0x9f   : > { %4988 = vmatpush3.msra.mxu1 %v5795_v4  ;;  %4960 = vmatprep.subr.mxu0 %v5828_v16 }
  0xa0   : > { %4989 = vmatprep.subr.mxu1 %v5797_v5  ;;  %4961 = vmatpush3.msra.mxu0 %v5828_v16  ;;  %v7534_v16 = vand.u32 4294901760, %v6349_v51 }
  0xa1   : > { %4990 = vmatpush3.msra.mxu1 %v5797_v5  ;;  %4962 = vmatprep.subr.mxu0 %v5839_v18 }
  0xa2   : > { %4991 = vmatprep.subr.mxu1 %v5808_v9  ;;  %4963 = vmatpush3.msra.mxu0 %v5839_v18 }
  0xa3   : > { %4992 = vmatpush3.msra.mxu1 %v5808_v9  ;;  %4964 = vmatprep.subr.mxu0 %v5842_v19 }
  0xa4   : > { %4993 = vmatprep.subr.mxu1 %v5810_v10  ;;  %4965 = vmatpush3.msra.mxu0 %v5842_v19  ;;  %v1839_v19 = vrot.slane %v1804_v60, 1 }
  0xa5   : > { %4994 = vmatpush3.msra.mxu1 %v5810_v10  ;;  %4966 = vmatprep.subr.mxu0 %v5845_v20 }
  0xa6   : > { %4995 = vmatprep.subr.mxu1 %v5812_v11  ;;  %4967 = vmatpush3.msra.mxu0 %v5845_v20  ;;  %v7533_v20 = vand.u32 4294901760, %v6342_v8 }
  0xa7   : > { %4996 = vmatpush3.msra.mxu1 %v5812_v11  ;;  %4968 = vmatprep.subr.mxu0 %v5860_v25 }
  0xa8   : > { %4997 = vmatprep.subr.mxu1 %v5830_v17  ;;  %4969 = vmatpush3.msra.mxu0 %v5860_v25 }
  0xa9   : > { %4998 = vmatpush3.msra.mxu1 %v5830_v17  ;;  %4970 = vmatprep.subr.mxu0 %v5873_v29 }
  0xaa   : > { %4999 = vmatprep.subr.mxu1 %v5847_v21  ;;  %4971 = vmatpush3.msra.mxu0 %v5873_v29  ;;  %v1826_v29 = vsel %vm260_vm0, %v1824_v37, %v1825_v27 }
  0xab   : > { %5000 = vmatpush3.msra.mxu1 %v5847_v21  ;;  %4972 = vmatprep.subr.mxu0 %v5953_v56 }
  0xac   : > { %5001 = vmatprep.subr.mxu1 %v5932_v48  ;;  %4973 = vmatpush3.msra.mxu0 %v5953_v56  ;;  %v6448_v56 = vrot.slane %v1799_v33, 1  ;;  %v1802_v33 = vmul.f32 0.21300554, %v6427_v45 }
  0xad   : > { %5002 = vmatpush3.msra.mxu1 %v5932_v48  ;;  %4974 = vmatprep.subr.mxu0 %v5956_v57 }
  0xae   : > { %5003 = vmatprep.subr.mxu1 %v5934_v49  ;;  %4975 = vmatpush3.msra.mxu0 %v5956_v57  ;;  %v1800_v57 = vmul.f32 0.21300554, %v6419_v38  ;;  %v1828_v25 = vsel %vm260_vm0, %v1825_v27, %v6448_v56  ;;  %v1851_v15 = vadd.f32 %v6448_v56, %v1802_v33 }
  0xaf   : > { %5004 = vmatpush3.msra.mxu1 %v5934_v49  ;;  %4976 = vmatprep.subr.mxu0 %v5959_v58 }
  0xb0   : > { %5005 = vmatprep.subr.mxu1 %v5936_v50  ;;  %4977 = vmatpush3.msra.mxu0 %v5959_v58  ;;  %v1801_v58 = vmul.f32 0.21300554, %v6423_v63  ;;  %v1849_v18 = vadd.f32 %v1826_v29, %v1800_v57  ;;  %v1876_v14 = vrot.slane %v1851_v15, 2 }
  0xb1   : > { %5006 = vmatpush3.msra.mxu1 %v5936_v50  ;;  %4978 = vmatprep.subr.mxu0 %v5969_v61 }
  0xb2   : > { %5007 = vmatprep.subr.mxu1 %v5944_v53  ;;  %4979 = vmatpush3.msra.mxu0 %v5969_v61  ;;  %v1805_v61 = vmul.f32 0.26601174, %v6427_v45  ;;  %v1850_v37 = vadd.f32 %v1828_v25, %v1801_v58  ;;  %v1873_v60 = vrot.slane %v1849_v18, 2 }
  0xb3   : > { %5008 = vmatpush3.msra.mxu1 %v5944_v53  ;;  %4980 = vmatprep.subr.mxu0 %v5972_v62 }
  0xb4   : > { %5009 = vmatprep.subr.mxu1 %v5946_v54  ;;  %4981 = vmatpush3.msra.mxu0 %v5972_v62  ;;  %v1838_v62 = vrot.slane %v1803_v55, 1  ;;  %v1841_v27 = vrot.slane %v1805_v61, 1  ;;  %v6489_v61 = vmul.f32 0.036000773, %v6423_v63 }
  0xb5   : > { %4982 = vmatprep.mubr.f32.mxu0 %v6342_v8  ;;  %5010 = vmatpush3.msra.mxu1 %v5946_v54  ;;  %v1792_v8 = vmul.f32 0.0075987587, %v6423_v63 }
  0xb6   : > { %4983 = vmatmul.mubr.f32.vlgmr.msra.gmra.mxu0 %v6349_v51  ;;  %5011 = vmatprep.mubr.f32.mxu1 %v7533_v20  ;;  %v1791_v20 = vmul.f32 0.0075987587, %v6419_v38  ;;  %v6485_v51 = vmul.f32 0.0075987587, %v6427_v45  ;;  %v1840_v55 = vsel %vm260_vm0, %v1838_v62, %v1839_v19  ;;  %v1833_v15 = vadd.f32 %v1828_v25, %v6489_v61 }
  0xb7   : > { %5014 = vmatprep.subr.mxu0 %v5850_v22  ;;  %5043 = vmatprep.subr.mxu1 %v5793_v3  ;;  %v1813_v18 = vrot.slane %v1792_v8, 1  ;;  %v1846_v1 = vadd.f32 %v1840_v55, %v1800_v57  ;;  %v1806_v8 = vmul.f32 0.0075987587, %v1788_v35  ;;  %v1789_v25 = vmul.f32 0.0010283802, %v6419_v38 }
  0xb8   : > { %5012 = vmatmul.mubr.f32.vlgmr.msra.gmra.mxu1 %v7534_v16  ;;  %5015 = vmatpush3.msra.mxu0 %v5850_v22  ;;  %v1794_v16 = vmul.f32 0.036000773, %v6419_v38  ;;  %v1874_v22 = vrot.slane %v1850_v37, 2  ;;  %v1812_v62 = vrot.slane %v1791_v20, 1  ;;  %v1815_v37 = vrot.slane %v6485_v51, 1 }
  0xb9   : > { %5044 = vmatpush3.msra.mxu1 %v5793_v3  ;;  %5016 = vmatprep.subr.mxu0 %v5854_v23  ;;  %v1848_v51 = vadd.f32 %v1841_v27, %v1802_v33  ;;  %v1807_v57 = vmul.f32 0.0010283802, %v6427_v45  ;;  %v1862_v33 = vrot.slane %v1833_v15, 2 }
  0xba   : > { %5045 = vmatprep.subr.mxu1 %v5795_v4  ;;  %5017 = vmatpush3.msra.mxu0 %v5854_v23  ;;  %v1842_v23 = vsel %vm260_vm0, %v1839_v19, %v1841_v27  ;;  %v1832_v19 = vadd.f32 %v1826_v29, %v1794_v16  ;;  %v1875_v30 = vsel %vm310_vm1, %v1873_v60, %v1874_v22  ;;  %v1808_v16 = vmul.f32 0.0010283802, %v1788_v35 }
  0xbb   : > { %5046 = vmatpush3.msra.mxu1 %v5795_v4  ;;  %5018 = vmatprep.subr.mxu0 %v5857_v24  ;;  %v1877_v20 = vsel %vm310_vm1, %v1874_v22, %v1876_v14  ;;  %v1834_v29 = vadd.f32 %v6448_v56, %v6500_v44  ;;  %v1814_v22 = vsel %vm260_vm0, %v1812_v62, %v1813_v18 }
  0xbc   : > { %5047 = vmatprep.subr.mxu1 %v5797_v5  ;;  %5019 = vmatpush3.msra.mxu0 %v5857_v24  ;;  %v1847_v24 = vadd.f32 %v1842_v23, %v1801_v58  ;;  %v1790_v23 = vmul.f32 0.0010283802, %v6423_v63  ;;  %v1816_v58 = vsel %vm260_vm0, %v1813_v18, %v1815_v37  ;;  %v1861_v56 = vrot.slane %v1832_v19, 2 }
  0xbd   : > { %5048 = vmatpush3.msra.mxu1 %v5797_v5  ;;  %5020 = vmatprep.subr.mxu0 %v5864_v26  ;;  %v1881_v27 = vadd.f32 %v1875_v30, %v1846_v1  ;;  %v1853_v63 = vrot.slane %v1806_v8, 1  ;;  %v1864_v55 = vrot.slane %v1834_v29, 2  ;;  %v1883_v45 = vadd.f32 %v1876_v14, %v1848_v51 }
  0xbe   : > { %5049 = vmatprep.subr.mxu1 %v5808_v9  ;;  %5021 = vmatpush3.msra.mxu0 %v5864_v26  ;;  %v1882_v38 = vadd.f32 %v1877_v20, %v1847_v24  ;;  %v1819_v60 = vadd.f32 %v1814_v22, %v1789_v25  ;;  %v1887_v62 = vrot.slane %v1790_v23, 2  ;;  %v1888_v30 = vrot.slane %v1807_v57, 2 }
  0xbf   : > { %5050 = vmatpush3.msra.mxu1 %v5808_v9  ;;  %5022 = vmatprep.subr.mxu0 %v7510_v39  ;;  %v1820_v24 = vadd.f32 %v1816_v58, %v1790_v23  ;;  %v1863_v35 = vsel %vm310_vm1, %v1861_v56, %v1862_v33  ;;  %v1899_v18 = vrot.slane %v1881_v27, 4  ;;  %v1854_v19 = vsel %vm260_vm0, %v1815_v37, %v1853_v63 }
  0xc0   : > { %5051 = vmatprep.subr.mxu1 %v5810_v10  ;;  %5023 = vmatpush3.msra.mxu0 %v7510_v39  ;;  %v1900_v14 = vrot.slane %v1882_v38, 4  ;;  %v1865_v15 = vsel %vm310_vm1, %v1862_v33, %v1864_v55  ;;  %v1890_v1 = vrot.slane %v1808_v16, 2  ;;  %v1902_v20 = vrot.slane %v1883_v45, 4 }
  0xc1   : > { %5052 = vmatpush3.msra.mxu1 %v5810_v10  ;;  %5024 = vmatprep.subr.mxu0 %v7511_v59  ;;  %v1856_v8 = vadd.f32 %v1816_v58, %v6489_v61  ;;  %v1868_v29 = vadd.f32 %v1863_v35, %v1819_v60  ;;  %v1889_v51 = vsel %vm310_vm1, %v1887_v62, %v1888_v30  ;;  %v7537_v35 = vld [vmem:[#allocation43_spill] sm:$0xff] }
  0xc2   : > { %5053 = vmatprep.subr.mxu1 %v5812_v11  ;;  %5025 = vmatpush3.msra.mxu0 %v7511_v59  ;;  %v1901_v37 = vsel %vm349_vm2, %v1899_v18, %v1900_v14  ;;  %v1857_v25 = vadd.f32 %v1854_v19, %v6500_v44  ;;  %v1869_v23 = vadd.f32 %v1865_v15, %v1820_v24  ;;  %v7539_v15 = vld [vmem:[#allocation45_spill] sm:$0xff] }
  0xc3   : > { %5054 = vmatpush3.msra.mxu1 %v5812_v11  ;;  %5026 = vmatprep.subr.mxu0 %v7512_v34  ;;  %v1891_v57 = vsel %vm310_vm1, %v1888_v30, %v1890_v1  ;;  %v1903_v61 = vsel %vm349_vm2, %v1900_v14, %v1902_v20  ;;  %v1894_v22 = vadd.f32 %v1889_v51, %v1856_v8  ;;  %v7536_v30 = vld [vmem:[#allocation42_spill] sm:$0xff]  ;;  %v7538_v14 = vld [vmem:[#allocation44_spill] sm:$0xff]  ;;  %v7540_v1 = vld [vmem:[#allocation5_spill] sm:$0xff] }
  0xc4   : > { %5055 = vmatprep.subr.mxu1 %v5830_v17  ;;  %5027 = vmatpush3.msra.mxu0 %v7512_v34  ;;  %v1906_v58 = vadd.f32 %v1901_v37, %v1868_v29  ;;  %v1895_v44 = vadd.f32 %v1891_v57, %v1857_v25  ;;  %v1907_v56 = vadd.f32 %v1903_v61, %v1869_v23  ;;  %v7541_v20 = vld [vmem:[#allocation6_spill] sm:$0xff]  ;;  %v7542_v8 = vld [vmem:[#allocation7_spill] sm:$0xff]  ;;  %v7543_v29 = vld [vmem:[#allocation8_spill] sm:$0xff] }
  0xc5   : > { %5056 = vmatpush3.msra.mxu1 %v5830_v17  ;;  %5028 = vmatprep.subr.mxu0 %v7513_v6  ;;  %v7544_v51 = vld [vmem:[#allocation9_spill] sm:$0xff]  ;;  %v7545_v37 = vld [vmem:[#allocation10_spill] sm:$0xff]  ;;  %v6669_v23 = vld [vmem:[%s6160_s28] sm:$0xff] }
  0xc6   : > { %5057 = vmatprep.subr.mxu1 %v5847_v21  ;;  %5029 = vmatpush3.msra.mxu0 %v7513_v6  ;;  %v1908_v33 = vadd.f32 %v1906_v58, %v1894_v22  ;;  %v1909_v27 = vadd.f32 %v1907_v56, %v1895_v44  ;;  %v7546_v25 = vld [vmem:[#allocation14_spill] sm:$0xff]  ;;  %7547 = vst [vmem:[#allocation15_spill] sm:$0xff] %v6669_v23  ;;  %v6676_v61 = vld [vmem:[%s6160_s28 + $0x8] sm:$0xff]  ;;  %v6683_v58 = vld [vmem:[%s6160_s28 + $0x10] sm:$0xff] }
  0xc7   : > { %5058 = vmatpush3.msra.mxu1 %v5847_v21  ;;  %5030 = vmatprep.subr.mxu0 %v7514_v47  ;;  %v6673_v57 = vmul.f32 %v6669_v23, %v6669_v23  ;;  %7548 = vst [vmem:[#allocation16_spill] sm:$0xff] %v6676_v61  ;;  %v6680_v22 = vmul.f32 %v6676_v61, %v6676_v61  ;;  %7549 = vst [vmem:[#allocation18_spill] sm:$0xff] %v6683_v58  ;;  %v7550_v56 = vld [vmem:[#allocation17_spill] sm:$0xff]  ;;  %v7557_v23 = vld [vmem:[#allocation11_spill] sm:$0xff] }
  0xc8   : > { %5059 = vmatprep.subr.mxu1 %v5932_v48  ;;  %5031 = vmatpush3.msra.mxu0 %v7514_v47  ;;  %v1914_v38 = vsel %vm361_vm3, %v1909_v27, 0  ;;  %v6687_v44 = vmul.f32 %v6683_v58, %v6683_v58 }
  0xc9   : > { %5060 = vmatpush3.msra.mxu1 %v5932_v48  ;;  %5032 = vmatprep.subr.mxu0 %v7515_v46  ;;  %v6586_v16 = vand.u32 4294901760, %v1914_v38  ;;  %v2573_v27 = vmul.f32 0.109360695, %v6673_v57 }
  0xca   : > { %5061 = vmatprep.subr.mxu1 %v5934_v49  ;;  %5033 = vmatpush3.msra.mxu0 %v7515_v46 }
  0xcb   : > { %5062 = vmatpush3.msra.mxu1 %v5934_v49  ;;  %5034 = vmatprep.subr.mxu0 %v7516_v36  ;;  %v6600_v55 = vsub.f32 %v1914_v38, %v6586_v16  ;;  %v2575_v38 = vmul.f32 0.109360695, %v6687_v44 }
  0xcc   : > { %5063 = vmatprep.subr.mxu1 %v5936_v50  ;;  %5035 = vmatpush3.msra.mxu0 %v7516_v36 }
  0xcd   : > { %5064 = vmatpush3.msra.mxu1 %v5936_v50  ;;  %5036 = vmatprep.subr.mxu0 %v7517_v52  ;;  %v7417_v60 = vand.u32 4294901760, %v6600_v55 }
  0xce   : > { %5065 = vmatprep.subr.mxu1 %v5944_v53  ;;  %5037 = vmatpush3.msra.mxu0 %v7517_v52 }
  0xcf   : > { %5066 = vmatpush3.msra.mxu1 %v5944_v53  ;;  %5038 = vmatprep.subr.mxu0 %v7519_v12  ;;  %v2007_v24 = vsub.f32 %v6600_v55, %v7417_v60  ;;  %v6708_v60 = vrot.slane %v2575_v38, 1  ;;  %v2578_v38 = vmul.f32 0.21300554, %v6687_v44 }
  0xd0   : > { %5067 = vmatprep.subr.mxu1 %v5946_v54  ;;  %5039 = vmatpush3.msra.mxu0 %v7519_v12 }
  0xd1   : > { %5040 = vmatprep.mubr.f32.mxu0 %v6329_v41  ;;  %5068 = vmatpush3.msra.mxu1 %v5946_v54  ;;  %v2008_v19 = vand.u32 4294901760, %v2007_v24  ;;  %v7553_v24 = vld [vmem:[#allocation28_spill] sm:$0xff] }
  0xd2   : > { %5041 = vmatmul.mubr.f32.vlgmr.msra.gmra.mxu0 %v6335_v31  ;;  %5069 = vmatprep.mubr.f32.mxu1 %v6329_v41  ;;  %v1911_v41 = vsel %vm361_vm3, %v1908_v33, 0  ;;  %v7551_v33 = vld [vmem:[#allocation26_spill] sm:$0xff] }
  0xd3   : > { %5072 = vmatprep.subr.mxu0 %v5793_v3  ;;  %5101 = vmatprep.subr.mxu1 %v7518_v2 }
  0xd4   : > { %5070 = vmatmul.mubr.f32.vlgmr.msra.gmra.mxu1 %v6335_v31  ;;  %5073 = vmatpush3.msra.mxu0 %v5793_v3  ;;  %v6582_v31 = vand.u32 4294901760, %v1911_v41 }
  0xd5   : > { %5102 = vmatpush3.msra.mxu1 %v7518_v2  ;;  %5074 = vmatprep.subr.mxu0 %v5795_v4 }
  0xd6   : > { %5103 = vmatprep.subr.mxu1 %v7520_v28  ;;  %5075 = vmatpush3.msra.mxu0 %v5795_v4  ;;  %v6595_v63 = vsub.f32 %v1911_v41, %v6582_v31  ;;  %v2574_v41 = vmul.f32 0.109360695, %v6680_v22 }
  0xd7   : > { %5104 = vmatpush3.msra.mxu1 %v7520_v28  ;;  %5076 = vmatprep.subr.mxu0 %v5797_v5 }
  0xd8   : > { %5105 = vmatprep.subr.mxu1 %v7521_v7  ;;  %5077 = vmatpush3.msra.mxu0 %v5797_v5  ;;  %v7418_v45 = vand.u32 4294901760, %v6595_v63  ;;  %v7556_v61 = vand.u32 4294901760, %v6595_v63 }
  0xd9   : > { %5106 = vmatpush3.msra.mxu1 %v7521_v7  ;;  %5078 = vmatprep.subr.mxu0 %v5808_v9 }
  0xda   : > { %5107 = vmatprep.subr.mxu1 %v7522_v32  ;;  %5079 = vmatpush3.msra.mxu0 %v5808_v9  ;;  %v1997_v62 = vsub.f32 %v6595_v63, %v7418_v45  ;;  %v7554_v45 = vld [vmem:[#allocation31_spill] sm:$0xff] }
  0xdb   : > { %5108 = vmatpush3.msra.mxu1 %v7522_v32  ;;  %5080 = vmatprep.subr.mxu0 %v5810_v10 }
  0xdc   : > { %5109 = vmatprep.subr.mxu1 %v7523_v40  ;;  %5081 = vmatpush3.msra.mxu0 %v5810_v10  ;;  %v1998_v18 = vand.u32 4294901760, %v1997_v62  ;;  %v7552_v62 = vld [vmem:[#allocation27_spill] sm:$0xff] }
  0xdd   : > { %5110 = vmatpush3.msra.mxu1 %v7523_v40  ;;  %5082 = vmatprep.subr.mxu0 %v5812_v11 }
  0xde   : > { %5111 = vmatprep.subr.mxu1 %v7524_v0  ;;  %5083 = vmatpush3.msra.mxu0 %v5812_v11 }
  0xdf   : > { %5112 = vmatpush3.msra.mxu1 %v7524_v0  ;;  %5084 = vmatprep.subr.mxu0 %v5830_v17 }
  0xe0   : > { %5113 = vmatprep.subr.mxu1 %v7525_v13  ;;  %5085 = vmatpush3.msra.mxu0 %v5830_v17 }
  0xe1   : > { %5114 = vmatpush3.msra.mxu1 %v7525_v13  ;;  %5086 = vmatprep.subr.mxu0 %v5847_v21 }
  0xe2   : > { %5115 = vmatprep.subr.mxu1 %v7526_v43  ;;  %5087 = vmatpush3.msra.mxu0 %v5847_v21 }
  0xe3   : > { %5116 = vmatpush3.msra.mxu1 %v7526_v43  ;;  %5088 = vmatprep.subr.mxu0 %v5932_v48 }
  0xe4   : > { %5117 = vmatprep.subr.mxu1 %v7527_v42  ;;  %5089 = vmatpush3.msra.mxu0 %v5932_v48 }
  0xe5   : > { %5118 = vmatpush3.msra.mxu1 %v7527_v42  ;;  %5090 = vmatprep.subr.mxu0 %v5934_v49 }
  0xe6   : > { %5119 = vmatprep.subr.mxu1 %v7536_v30  ;;  %5091 = vmatpush3.msra.mxu0 %v5934_v49 }
  0xe7   : > { %5120 = vmatpush3.msra.mxu1 %v7536_v30  ;;  %5092 = vmatprep.subr.mxu0 %v5936_v50 }
  0xe8   : > { %5121 = vmatprep.subr.mxu1 %v7537_v35  ;;  %5093 = vmatpush3.msra.mxu0 %v5936_v50 }
  0xe9   : > { %5122 = vmatpush3.msra.mxu1 %v7537_v35  ;;  %5094 = vmatprep.subr.mxu0 %v5944_v53  ;;  %v6766_v35 = vmul.f32 0.036000773, %v6687_v44 }
  0xea   : > { %5123 = vmatprep.subr.mxu1 %v7538_v14  ;;  %5095 = vmatpush3.msra.mxu0 %v5944_v53 }
  0xeb   : > { %5124 = vmatpush3.msra.mxu1 %v7538_v14  ;;  %5096 = vmatprep.subr.mxu0 %v5946_v54 }
  0xec   : > { %5125 = vmatprep.subr.mxu1 %v7539_v15  ;;  %5097 = vmatpush3.msra.mxu0 %v5946_v54 }
  0xed   : > { %5098 = vmatprep.mubr.f32.mxu0 %v1998_v18  ;;  %5126 = vmatpush3.msra.mxu1 %v7539_v15  ;;  %v2600_v18 = vrot.slane %v2573_v27, 1  ;;  %v2579_v27 = vmul.f32 0.26601174, %v6673_v57  ;;  %v6761_v15 = vld [vmem:[%s6160_s28 + $0x18] sm:$0x3] }
  0xee   : > { %5127 = vmatprep.mubr.f32.mxu1 %v6582_v31  ;;  %5099 = vmatmul.mubr.f32.vlgmr.msra.gmra.mxu0 %v2008_v19  ;;  %v2601_v19 = vrot.slane %v2574_v41, 1  ;;  %v2580_v41 = vmul.f32 0.26601174, %v6680_v22  ;;  %7561 = vst [vmem:[#allocation19_spill] sm:$0xff] %v6761_v15  ;;  %v2564_v14 = vmul.f32 %v6761_v15, %v6761_v15 }
  0xef   : > { %5128 = vmatmul.mubr.f32.vlgmr.msra.gmra.mxu1 %v6586_v16  ;;  %5130 = vmatprep.subr.mxu0 %v7540_v1 }
  0xf0   : > { %5159 = vmatprep.subr.mxu1 %v5793_v3  ;;  %5131 = vmatpush3.msra.mxu0 %v7540_v1  ;;  %v2604_v58 = vsel %vm260_vm0, %v2601_v19, %v6708_v60 }
  0xf1   : > { %5160 = vmatpush3.msra.mxu1 %v5793_v3  ;;  %5132 = vmatprep.subr.mxu0 %v7541_v20 }
  0xf2   : > { %5161 = vmatprep.subr.mxu1 %v5795_v4  ;;  %5133 = vmatpush3.msra.mxu0 %v7541_v20 }
  0xf3   : > { %5162 = vmatpush3.msra.mxu1 %v5795_v4  ;;  %5134 = vmatprep.subr.mxu0 %v7542_v8 }
  0xf4   : > { %5163 = vmatprep.subr.mxu1 %v5797_v5  ;;  %5135 = vmatpush3.msra.mxu0 %v7542_v8 }
  0xf5   : > { %5164 = vmatpush3.msra.mxu1 %v5797_v5  ;;  %5136 = vmatprep.subr.mxu0 %v7543_v29 }
  0xf6   : > { %5165 = vmatprep.subr.mxu1 %v5808_v9  ;;  %5137 = vmatpush3.msra.mxu0 %v7543_v29  ;;  %v6738_v29 = vadd.f32 %v6708_v60, %v2578_v38 }
  0xf7   : > { %5166 = vmatpush3.msra.mxu1 %v5808_v9  ;;  %5138 = vmatprep.subr.mxu0 %v7544_v51 }
  0xf8   : > { %5167 = vmatprep.subr.mxu1 %v5810_v10  ;;  %5139 = vmatpush3.msra.mxu0 %v7544_v51  ;;  %v7558_v51 = vand.u32 4294901760, %v6600_v55  ;;  %v2652_v1 = vrot.slane %v6738_v29, 2 }
  0xf9   : > { %5168 = vmatpush3.msra.mxu1 %v5810_v10  ;;  %5140 = vmatprep.subr.mxu0 %v7545_v37 }
  0xfa   : > { %5169 = vmatprep.subr.mxu1 %v5812_v11  ;;  %5141 = vmatpush3.msra.mxu0 %v7545_v37 }
  0xfb   : > { %5170 = vmatpush3.msra.mxu1 %v5812_v11  ;;  %5142 = vmatprep.subr.mxu0 %v7546_v25 }
  0xfc   : > { %5171 = vmatprep.subr.mxu1 %v5830_v17  ;;  %5143 = vmatpush3.msra.mxu0 %v7546_v25  ;;  %v2615_v25 = vrot.slane %v2580_v41, 1  ;;  %v7560_v41 = vld [vmem:[#allocation13_spill] sm:$0xff] }
  0xfd   : > { %5172 = vmatpush3.msra.mxu1 %v5830_v17  ;;  %5144 = vmatprep.subr.mxu0 %v7550_v56 }
  0xfe   : > { %5173 = vmatprep.subr.mxu1 %v5847_v21  ;;  %5145 = vmatpush3.msra.mxu0 %v7550_v56  ;;  %v2602_v56 = vsel %vm260_vm0, %v2600_v18, %v2601_v19 }
  0xff   : > { %5174 = vmatpush3.msra.mxu1 %v5847_v21  ;;  %5146 = vmatprep.subr.mxu0 %v7551_v33 }
 0x100   : > { %5175 = vmatprep.subr.mxu1 %v5932_v48  ;;  %5147 = vmatpush3.msra.mxu0 %v7551_v33  ;;  %v7555_v33 = vld [vmem:[#allocation32_spill] sm:$0xff] }
 0x101   : > { %5176 = vmatpush3.msra.mxu1 %v5932_v48  ;;  %5148 = vmatprep.subr.mxu0 %v7552_v62 }
 0x102   : > { %5177 = vmatprep.subr.mxu1 %v5934_v49  ;;  %5149 = vmatpush3.msra.mxu0 %v7552_v62  ;;  %v2576_v62 = vmul.f32 0.21300554, %v6673_v57 }
 0x103   : > { %5178 = vmatpush3.msra.mxu1 %v5934_v49  ;;  %5150 = vmatprep.subr.mxu0 %v7553_v24 }
 0x104   : > { %5179 = vmatprep.subr.mxu1 %v5936_v50  ;;  %5151 = vmatpush3.msra.mxu0 %v7553_v24  ;;  %v2577_v24 = vmul.f32 0.21300554, %v6680_v22  ;;  %v2625_v37 = vadd.f32 %v2602_v56, %v2576_v62 }
 0x105   : > { %5180 = vmatpush3.msra.mxu1 %v5936_v50  ;;  %5152 = vmatprep.subr.mxu0 %v7554_v45 }
 0x106   : > { %5181 = vmatprep.subr.mxu1 %v5944_v53  ;;  %5153 = vmatpush3.msra.mxu0 %v7554_v45  ;;  %v2581_v45 = vmul.f32 0.26601174, %v6687_v44  ;;  %v2626_v18 = vadd.f32 %v2604_v58, %v2577_v24  ;;  %v2649_v8 = vrot.slane %v2625_v37, 2 }
 0x107   : > { %5182 = vmatpush3.msra.mxu1 %v5944_v53  ;;  %5154 = vmatprep.subr.mxu0 %v7555_v33 }
 0x108   : > { %5183 = vmatprep.subr.mxu1 %v5946_v54  ;;  %5155 = vmatpush3.msra.mxu0 %v7555_v33  ;;  %v2614_v33 = vrot.slane %v2579_v27, 1  ;;  %v2617_v19 = vrot.slane %v2581_v45, 1  ;;  %v2568_v27 = vmul.f32 0.0075987587, %v6680_v22  ;;  %v2570_v45 = vmul.f32 0.036000773, %v6673_v57 }
 0x109   : > { %5156 = vmatprep.mubr.f32.mxu0 %v6595_v63  ;;  %5184 = vmatpush3.msra.mxu1 %v5946_v54  ;;  %v7559_v63 = vld [vmem:[#allocation12_spill] sm:$0xff]  ;;  %v2650_v20 = vrot.slane %v2626_v18, 2 }
 0x10a   : > { %5157 = vmatmul.mubr.f32.vlgmr.msra.gmra.mxu0 %v6600_v55  ;;  %5185 = vmatprep.mubr.f32.mxu1 %v7556_v61  ;;  %v2567_v61 = vmul.f32 0.0075987587, %v6673_v57  ;;  %v6747_v55 = vmul.f32 0.0075987587, %v6687_v44 }
 0x10b   : > { %5188 = vmatprep.subr.mxu0 %v7557_v23  ;;  %5217 = vmatprep.subr.mxu1 %v5793_v3  ;;  %v2651_v30 = vsel %vm310_vm1, %v2649_v8, %v2650_v20  ;;  %v2566_v8 = vmul.f32 0.0010283802, %v6680_v22 }
 0x10c   : > { %5186 = vmatmul.mubr.f32.vlgmr.msra.gmra.mxu1 %v7558_v51  ;;  %5189 = vmatpush3.msra.mxu0 %v7557_v23  ;;  %v6751_v51 = vmul.f32 0.036000773, %v6680_v22  ;;  %v2616_v23 = vsel %vm260_vm0, %v2614_v33, %v2615_v25  ;;  %v2588_v37 = vrot.slane %v2567_v61, 1  ;;  %v2591_v29 = vrot.slane %v6747_v55, 1 }
 0x10d   : > { %5218 = vmatpush3.msra.mxu1 %v5793_v3  ;;  %5190 = vmatprep.subr.mxu0 %v7559_v63  ;;  %v2608_v33 = vadd.f32 %v2602_v56, %v2570_v45  ;;  %v2622_v15 = vadd.f32 %v2616_v23, %v2576_v62  ;;  %v2653_v61 = vsel %vm310_vm1, %v2650_v20, %v2652_v1  ;;  %v2565_v23 = vmul.f32 0.0010283802, %v6673_v57 }
 0x10e   : > { %5219 = vmatprep.subr.mxu1 %v5795_v4  ;;  %5191 = vmatpush3.msra.mxu0 %v7559_v63  ;;  %v2618_v63 = vsel %vm260_vm0, %v2615_v25, %v2617_v19  ;;  %v2589_v25 = vrot.slane %v2568_v27, 1  ;;  %v2609_v18 = vadd.f32 %v2604_v58, %v6751_v51  ;;  %v2582_v27 = vmul.f32 0.0075987587, %v2564_v14 }
 0x10f   : > { %5220 = vmatpush3.msra.mxu1 %v5795_v4  ;;  %5192 = vmatprep.subr.mxu0 %v7560_v41  ;;  %v2610_v56 = vadd.f32 %v6708_v60, %v6766_v35  ;;  %v2624_v55 = vadd.f32 %v2617_v19, %v2578_v38  ;;  %v2583_v58 = vmul.f32 0.0010283802, %v6687_v44  ;;  %v2637_v60 = vrot.slane %v2608_v33, 2 }
 0x110   : > { %5221 = vmatprep.subr.mxu1 %v5797_v5  ;;  %5193 = vmatpush3.msra.mxu0 %v7560_v41  ;;  %v2623_v41 = vadd.f32 %v2618_v63, %v2577_v24  ;;  %v2590_v20 = vsel %vm260_vm0, %v2588_v37, %v2589_v25  ;;  %v2592_v62 = vsel %vm260_vm0, %v2589_v25, %v2591_v29  ;;  %v2638_v24 = vrot.slane %v2609_v18, 2 }
 0x111   : > { %5222 = vmatpush3.msra.mxu1 %v5797_v5  ;;  %5194 = vmatprep.subr.mxu0 %v5864_v26  ;;  %v2657_v38 = vadd.f32 %v2651_v30, %v2622_v15  ;;  %v2584_v19 = vmul.f32 0.0010283802, %v2564_v14  ;;  %v2629_v22 = vrot.slane %v2582_v27, 1  ;;  %v2640_v63 = vrot.slane %v2610_v56, 2 }
 0x112   : > { %5223 = vmatprep.subr.mxu1 %v5808_v9  ;;  %5195 = vmatpush3.msra.mxu0 %v5864_v26  ;;  %v2658_v57 = vadd.f32 %v2653_v61, %v2623_v41  ;;  %v2659_v44 = vadd.f32 %v2652_v1, %v2624_v55  ;;  %v2595_v45 = vadd.f32 %v2590_v20, %v2565_v23  ;;  %v2663_v37 = vrot.slane %v2566_v8, 2 }
 0x113   : > { %5224 = vmatpush3.msra.mxu1 %v5808_v9  ;;  %5196 = vmatprep.subr.mxu0 %v7510_v39  ;;  %v2664_v30 = vrot.slane %v2583_v58, 2  ;;  %v2596_v15 = vadd.f32 %v2592_v62, %v2566_v8  ;;  %v2639_v14 = vsel %vm310_vm1, %v2637_v60, %v2638_v24  ;;  %v2675_v41 = vrot.slane %v2657_v38, 4 }
 0x114   : > { %5225 = vmatprep.subr.mxu1 %v5810_v10  ;;  %5197 = vmatpush3.msra.mxu0 %v7510_v39  ;;  %v2676_v1 = vrot.slane %v2658_v57, 4  ;;  %v2630_v25 = vsel %vm260_vm0, %v2591_v29, %v2629_v22  ;;  %v2641_v33 = vsel %vm310_vm1, %v2638_v24, %v2640_v63  ;;  %v2666_v18 = vrot.slane %v2584_v19, 2 }
 0x115   : > { %5226 = vmatpush3.msra.mxu1 %v5810_v10  ;;  %5198 = vmatprep.subr.mxu0 %v7511_v59  ;;  %v2678_v61 = vrot.slane %v2659_v44, 4  ;;  %v2632_v27 = vadd.f32 %v2592_v62, %v6751_v51  ;;  %v2644_v56 = vadd.f32 %v2639_v14, %v2595_v45  ;;  %v2665_v55 = vsel %vm310_vm1, %v2663_v37, %v2664_v30  ;;  %v7563_v14 = vld [vmem:[#allocation43_spill] sm:$0xff] }
 0x116   : > { %5227 = vmatprep.subr.mxu1 %v5812_v11  ;;  %5199 = vmatpush3.msra.mxu0 %v7511_v59  ;;  %v2677_v29 = vsel %vm349_vm2, %v2675_v41, %v2676_v1  ;;  %v2633_v23 = vadd.f32 %v2630_v25, %v6766_v35  ;;  %v2645_v8 = vadd.f32 %v2641_v33, %v2596_v15  ;;  %v7565_v33 = vld [vmem:[#allocation45_spill] sm:$0xff] }
 0x117   : > { %5228 = vmatpush3.msra.mxu1 %v5812_v11  ;;  %5200 = vmatprep.subr.mxu0 %v7512_v34  ;;  %v2667_v58 = vsel %vm310_vm1, %v2664_v30, %v2666_v18  ;;  %v2679_v51 = vsel %vm349_vm2, %v2676_v1, %v2678_v61  ;;  %v2670_v20 = vadd.f32 %v2665_v55, %v2632_v27  ;;  %v7562_v30 = vld [vmem:[#allocation42_spill] sm:$0xff]  ;;  %v7564_v1 = vld [vmem:[#allocation44_spill] sm:$0xff]  ;;  %v7566_v18 = vld [vmem:[#allocation5_spill] sm:$0xff] }
 0x118   : > { %5229 = vmatprep.subr.mxu1 %v5830_v17  ;;  %5201 = vmatpush3.msra.mxu0 %v7512_v34  ;;  %v2682_v62 = vadd.f32 %v2677_v29, %v2644_v56  ;;  %v2671_v35 = vadd.f32 %v2667_v58, %v2633_v23  ;;  %v2683_v60 = vadd.f32 %v2679_v51, %v2645_v8  ;;  %v7567_v61 = vld [vmem:[#allocation6_spill] sm:$0xff]  ;;  %v7568_v27 = vld [vmem:[#allocation7_spill] sm:$0xff]  ;;  %v7569_v56 = vld [vmem:[#allocation8_spill] sm:$0xff] }
 0x119   : > { %5230 = vmatpush3.msra.mxu1 %v5830_v17  ;;  %5202 = vmatprep.subr.mxu0 %v7513_v6  ;;  %v7570_v55 = vld [vmem:[#allocation9_spill] sm:$0xff]  ;;  %v7571_v29 = vld [vmem:[#allocation10_spill] sm:$0xff]  ;;  %v5643_v8 = vld [vmem:[%s5926_s14] sm:$0xff] }
 0x11a   : > { %5231 = vmatprep.subr.mxu1 %v5847_v21  ;;  %5203 = vmatpush3.msra.mxu0 %v7513_v6  ;;  %v2684_v24 = vadd.f32 %v2682_v62, %v2670_v20  ;;  %v2685_v38 = vadd.f32 %v2683_v60, %v2671_v35  ;;  %v7572_v23 = vld [vmem:[#allocation14_spill] sm:$0xff]  ;;  %v7573_v58 = vld [vmem:[#allocation15_spill] sm:$0xff]  ;;  %v5644_v20 = vld [vmem:[%s5926_s14 + $0x8] sm:$0xff] }
 0x11b   : > { %5232 = vmatpush3.msra.mxu1 %v5847_v21  ;;  %5204 = vmatprep.subr.mxu0 %v7514_v47  ;;  %v6936_v51 = vmul.f32 %v5643_v8, %v7573_v58  ;;  %v7574_v62 = vld [vmem:[#allocation16_spill] sm:$0xff]  ;;  %v5645_v60 = vld [vmem:[%s5926_s14 + $0x10] sm:$0xff] }
 0x11c   : > { %5233 = vmatprep.subr.mxu1 %v5932_v48  ;;  %5205 = vmatpush3.msra.mxu0 %v7514_v47  ;;  %v2690_v57 = vsel %vm361_vm3, %v2685_v38, 0  ;;  %v6940_v35 = vmul.f32 %v5644_v20, %v7574_v62  ;;  %v7579_v8 = vld [vmem:[#allocation28_spill] sm:$0xff] }
 0x11d   : > { %5234 = vmatpush3.msra.mxu1 %v5932_v48  ;;  %5206 = vmatprep.subr.mxu0 %v7515_v46  ;;  %v6852_v19 = vand.u32 4294901760, %v2690_v57 }
 0x11e   : > { %5235 = vmatprep.subr.mxu1 %v5934_v49  ;;  %5207 = vmatpush3.msra.mxu0 %v7515_v46 }
 0x11f   : > { %5236 = vmatpush3.msra.mxu1 %v5934_v49  ;;  %5208 = vmatprep.subr.mxu0 %v7516_v36  ;;  %v6866_v63 = vsub.f32 %v2690_v57, %v6852_v19  ;;  %v7577_v57 = vld [vmem:[#allocation26_spill] sm:$0xff] }
 0x120   : > { %5237 = vmatprep.subr.mxu1 %v5936_v50  ;;  %5209 = vmatpush3.msra.mxu0 %v7516_v36 }
 0x121   : > { %5238 = vmatpush3.msra.mxu1 %v5936_v50  ;;  %5210 = vmatprep.subr.mxu0 %v7517_v52  ;;  %v7443_v45 = vand.u32 4294901760, %v6866_v63 }
 0x122   : > { %5239 = vmatprep.subr.mxu1 %v5944_v53  ;;  %5211 = vmatpush3.msra.mxu0 %v7517_v52 }
 0x123   : > { %5240 = vmatpush3.msra.mxu1 %v5944_v53  ;;  %5212 = vmatprep.subr.mxu0 %v7519_v12  ;;  %v2783_v15 = vsub.f32 %v6866_v63, %v7443_v45  ;;  %v7581_v45 = vld [vmem:[#allocation32_spill] sm:$0xff] }
 0x124   : > { %5241 = vmatprep.subr.mxu1 %v5946_v54  ;;  %5213 = vmatpush3.msra.mxu0 %v7519_v12 }
 0x125   : > { %5214 = vmatprep.mubr.f32.mxu0 %v6582_v31  ;;  %5242 = vmatpush3.msra.mxu1 %v5946_v54  ;;  %v2784_v25 = vand.u32 4294901760, %v2783_v15  ;;  %v3350_v15 = vmul.f32 0.109360695, %v6940_v35 }
 0x126   : > { %5215 = vmatmul.mubr.f32.vlgmr.msra.gmra.mxu0 %v6586_v16  ;;  %5243 = vmatprep.mubr.f32.mxu1 %v6582_v31  ;;  %v2687_v31 = vsel %vm361_vm3, %v2684_v24, 0  ;;  %v7575_v24 = vld [vmem:[#allocation18_spill] sm:$0xff] }
 0x127   : > { %5246 = vmatprep.subr.mxu0 %v5793_v3  ;;  %5275 = vmatprep.subr.mxu1 %v7518_v2  ;;  %v6944_v38 = vmul.f32 %v5645_v60, %v7575_v24  ;;  %v3377_v20 = vrot.slane %v3350_v15, 1  ;;  %v7580_v60 = vld [vmem:[#allocation31_spill] sm:$0xff]  ;;  %v3352_v24 = vmul.f32 0.21300554, %v6936_v51  ;;  %v3356_v15 = vmul.f32 0.26601174, %v6940_v35 }
 0x128   : > { %5244 = vmatmul.mubr.f32.vlgmr.msra.gmra.mxu1 %v6586_v16  ;;  %5247 = vmatpush3.msra.mxu0 %v5793_v3  ;;  %v6848_v16 = vand.u32 4294901760, %v2687_v31 }
 0x129   : > { %5276 = vmatpush3.msra.mxu1 %v7518_v2  ;;  %5248 = vmatprep.subr.mxu0 %v5795_v4 }
 0x12a   : > { %5277 = vmatprep.subr.mxu1 %v7520_v28  ;;  %5249 = vmatpush3.msra.mxu0 %v5795_v4  ;;  %v6861_v22 = vsub.f32 %v2687_v31, %v6848_v16  ;;  %v7576_v31 = vld [vmem:[#allocation17_spill] sm:$0xff] }
 0x12b   : > { %5278 = vmatpush3.msra.mxu1 %v7520_v28  ;;  %5250 = vmatprep.subr.mxu0 %v5797_v5 }
 0x12c   : > { %5279 = vmatprep.subr.mxu1 %v7521_v7  ;;  %5251 = vmatpush3.msra.mxu0 %v5797_v5  ;;  %v7444_v44 = vand.u32 4294901760, %v6861_v22 }
 0x12d   : > { %5280 = vmatpush3.msra.mxu1 %v7521_v7  ;;  %5252 = vmatprep.subr.mxu0 %v5808_v9 }
 0x12e   : > { %5281 = vmatprep.subr.mxu1 %v7522_v32  ;;  %5253 = vmatpush3.msra.mxu0 %v5808_v9  ;;  %v2773_v37 = vsub.f32 %v6861_v22, %v7444_v44  ;;  %v3353_v44 = vmul.f32 0.21300554, %v6940_v35 }
 0x12f   : > { %5282 = vmatpush3.msra.mxu1 %v7522_v32  ;;  %5254 = vmatprep.subr.mxu0 %v5810_v10 }
 0x130   : > { %5283 = vmatprep.subr.mxu1 %v7523_v40  ;;  %5255 = vmatpush3.msra.mxu0 %v5810_v10  ;;  %v2774_v41 = vand.u32 4294901760, %v2773_v37  ;;  %v3349_v37 = vmul.f32 0.109360695, %v6936_v51 }
 0x131   : > { %5284 = vmatpush3.msra.mxu1 %v7523_v40  ;;  %5256 = vmatprep.subr.mxu0 %v5812_v11 }
 0x132   : > { %5285 = vmatprep.subr.mxu1 %v7524_v0  ;;  %5257 = vmatpush3.msra.mxu0 %v5812_v11  ;;  %v3376_v58 = vrot.slane %v3349_v37, 1  ;;  %v3355_v37 = vmul.f32 0.26601174, %v6936_v51 }
 0x133   : > { %5286 = vmatpush3.msra.mxu1 %v7524_v0  ;;  %5258 = vmatprep.subr.mxu0 %v5830_v17 }
 0x134   : > { %5287 = vmatprep.subr.mxu1 %v7525_v13  ;;  %5259 = vmatpush3.msra.mxu0 %v5830_v17 }
 0x135   : > { %5288 = vmatpush3.msra.mxu1 %v7525_v13  ;;  %5260 = vmatprep.subr.mxu0 %v5847_v21 }
 0x136   : > { %5289 = vmatprep.subr.mxu1 %v7526_v43  ;;  %5261 = vmatpush3.msra.mxu0 %v5847_v21 }
 0x137   : > { %5290 = vmatpush3.msra.mxu1 %v7526_v43  ;;  %5262 = vmatprep.subr.mxu0 %v5932_v48 }
 0x138   : > { %5291 = vmatprep.subr.mxu1 %v7527_v42  ;;  %5263 = vmatpush3.msra.mxu0 %v5932_v48 }
 0x139   : > { %5292 = vmatpush3.msra.mxu1 %v7527_v42  ;;  %5264 = vmatprep.subr.mxu0 %v5934_v49 }
 0x13a   : > { %5293 = vmatprep.subr.mxu1 %v7562_v30  ;;  %5265 = vmatpush3.msra.mxu0 %v5934_v49 }
 0x13b   : > { %5294 = vmatpush3.msra.mxu1 %v7562_v30  ;;  %5266 = vmatprep.subr.mxu0 %v5936_v50  ;;  %v7020_v30 = vmul.f32 0.036000773, %v6944_v38 }
 0x13c   : > { %5295 = vmatprep.subr.mxu1 %v7563_v14  ;;  %5267 = vmatpush3.msra.mxu0 %v5936_v50 }
 0x13d   : > { %5296 = vmatpush3.msra.mxu1 %v7563_v14  ;;  %5268 = vmatprep.subr.mxu0 %v5944_v53 }
 0x13e   : > { %5297 = vmatprep.subr.mxu1 %v7564_v1  ;;  %5269 = vmatpush3.msra.mxu0 %v5944_v53 }
 0x13f   : > { %5298 = vmatpush3.msra.mxu1 %v7564_v1  ;;  %5270 = vmatprep.subr.mxu0 %v5946_v54  ;;  %v7587_v1 = vld [vmem:[#allocation19_spill] sm:$0xff] }
 0x140   : > { %5299 = vmatprep.subr.mxu1 %v7565_v33  ;;  %5271 = vmatpush3.msra.mxu0 %v5946_v54 }
 0x141   : > { %5272 = vmatprep.mubr.f32.mxu0 %v2774_v41  ;;  %5300 = vmatpush3.msra.mxu1 %v7565_v33  ;;  %v3351_v41 = vmul.f32 0.109360695, %v6944_v38  ;;  %v5646_v33 = vld [vmem:[%s5926_s14 + $0x18] sm:$0x3]  ;;  %s5709_s14 = smov [#allocation2]  }
 0x142   : > { %5301 = vmatprep.mubr.f32.mxu1 %v6848_v16  ;;  %5273 = vmatmul.mubr.f32.vlgmr.msra.gmra.mxu0 %v2784_v25  ;;  %v7578_v25 = vld [vmem:[#allocation27_spill] sm:$0xff]  ;;  %v3340_v14 = vmul.f32 %v5646_v33, %v7587_v1  ;;  %s5651_s19 = sshll.u32 %s5709_s14, 4  ;;  %s5652_s19 = int_to_ptr.vmem [resolvable:$false] %s5651_s19 }
 0x143   : > { %5302 = vmatmul.mubr.f32.vlgmr.msra.gmra.mxu1 %v6852_v19  ;;  %5304 = vmatprep.subr.mxu0 %v7566_v18  ;;  %v6965_v62 = vrot.slane %v3351_v41, 1  ;;  %v3354_v41 = vmul.f32 0.21300554, %v6944_v38  ;;  %s5653_s20 = scalar_lea.vmem %s5652_s19, 256  ;;  %p5654_p0 = scmp.lt.s32.totalorder %s7289_s6, %s5652_s19 }
 0x144   : > { %5333 = vmatprep.subr.mxu1 %v5793_v3  ;;  %5305 = vmatpush3.msra.mxu0 %v7566_v18  ;;  %p5655_p1 = scmp.lt.s32.totalorder %s5653_s20, %s5647_s13 }
 0x145   : > { %5334 = vmatpush3.msra.mxu1 %v5793_v3  ;;  %5306 = vmatprep.subr.mxu0 %v7567_v61 }
 0x146   : > { %5335 = vmatprep.subr.mxu1 %v5795_v4  ;;  %5307 = vmatpush3.msra.mxu0 %v7567_v61  ;;  %p5656_p2 = por %p5655_p1, %p5654_p0 }
 0x147   : > { %5336 = vmatpush3.msra.mxu1 %v5795_v4  ;;  %5308 = vmatprep.subr.mxu0 %v7568_v27 }
 0x148   : > { %5337 = vmatprep.subr.mxu1 %v5797_v5  ;;  %5309 = vmatpush3.msra.mxu0 %v7568_v27  ;;  %p5657_p3 = pnand %p5656_p2, %p5650_p13 }
 0x149   : > { %5338 = vmatpush3.msra.mxu1 %v5797_v5  ;;  %5310 = vmatprep.subr.mxu0 %v7569_v56 }
 0x14a   : > { %5339 = vmatprep.subr.mxu1 %v5808_v9  ;;  %5311 = vmatpush3.msra.mxu0 %v7569_v56  ;;  %v6995_v56 = vadd.f32 %v6965_v62, %v3354_v41 }
 0x14b   : > { %5340 = vmatpush3.msra.mxu1 %v5808_v9  ;;  %5312 = vmatprep.subr.mxu0 %v7570_v55 }
 0x14c   : > { %5341 = vmatprep.subr.mxu1 %v5810_v10  ;;  %5313 = vmatpush3.msra.mxu0 %v7570_v55  ;;  %v7584_v55 = vand.u32 4294901760, %v6866_v63  ;;  %v3428_v18 = vrot.slane %v6995_v56, 2 }
 0x14d   : > { %5342 = vmatpush3.msra.mxu1 %v5810_v10  ;;  %5314 = vmatprep.subr.mxu0 %v7571_v29 }
 0x14e   : > { %5343 = vmatprep.subr.mxu1 %v5812_v11  ;;  %5315 = vmatpush3.msra.mxu0 %v7571_v29 }
 0x14f   : > { %5344 = vmatpush3.msra.mxu1 %v5812_v11  ;;  %5316 = vmatprep.subr.mxu0 %v7572_v23 }
 0x150   : > { %5345 = vmatprep.subr.mxu1 %v5830_v17  ;;  %5317 = vmatpush3.msra.mxu0 %v7572_v23  ;;  %v3391_v23 = vrot.slane %v3356_v15, 1  ;;  %v7586_v15 = vld [vmem:[#allocation13_spill] sm:$0xff] }
 0x151   : > { %5346 = vmatpush3.msra.mxu1 %v5830_v17  ;;  %5318 = vmatprep.subr.mxu0 %v7576_v31 }
 0x152   : > { %5347 = vmatprep.subr.mxu1 %v5847_v21  ;;  %5319 = vmatpush3.msra.mxu0 %v7576_v31  ;;  %v7583_v31 = vld [vmem:[#allocation11_spill] sm:$0xff] }
 0x153   : > { %5348 = vmatpush3.msra.mxu1 %v5847_v21  ;;  %5320 = vmatprep.subr.mxu0 %v7577_v57 }
 0x154   : > { %5349 = vmatprep.subr.mxu1 %v5932_v48  ;;  %5321 = vmatpush3.msra.mxu0 %v7577_v57  ;;  %v7582_v57 = vand.u32 4294901760, %v6861_v22 }
 0x155   : > { %5350 = vmatpush3.msra.mxu1 %v5932_v48  ;;  %5322 = vmatprep.subr.mxu0 %v7578_v25 }
 0x156   : > { %5351 = vmatprep.subr.mxu1 %v5934_v49  ;;  %5323 = vmatpush3.msra.mxu0 %v7578_v25  ;;  %v3380_v25 = vsel %vm260_vm0, %v3377_v20, %v6965_v62 }
 0x157   : > { %5352 = vmatpush3.msra.mxu1 %v5934_v49  ;;  %5324 = vmatprep.subr.mxu0 %v7579_v8 }
 0x158   : > { %5353 = vmatprep.subr.mxu1 %v5936_v50  ;;  %5325 = vmatpush3.msra.mxu0 %v7579_v8  ;;  %v3378_v8 = vsel %vm260_vm0, %v3376_v58, %v3377_v20  ;;  %v3402_v58 = vadd.f32 %v3380_v25, %v3353_v44 }
 0x159   : > { %5354 = vmatpush3.msra.mxu1 %v5936_v50  ;;  %5326 = vmatprep.subr.mxu0 %v7580_v60  ;;  %v3401_v29 = vadd.f32 %v3378_v8, %v3352_v24 }
 0x15a   : > { %5355 = vmatprep.subr.mxu1 %v5944_v53  ;;  %5327 = vmatpush3.msra.mxu0 %v7580_v60  ;;  %v3357_v60 = vmul.f32 0.26601174, %v6944_v38  ;;  %v3426_v61 = vrot.slane %v3402_v58, 2 }
 0x15b   : > { %5356 = vmatpush3.msra.mxu1 %v5944_v53  ;;  %5328 = vmatprep.subr.mxu0 %v7581_v45  ;;  %v3425_v27 = vrot.slane %v3401_v29, 2 }
 0x15c   : > { %5357 = vmatprep.subr.mxu1 %v5946_v54  ;;  %5329 = vmatpush3.msra.mxu0 %v7581_v45  ;;  %v3390_v45 = vrot.slane %v3355_v37, 1  ;;  %v3393_v20 = vrot.slane %v3357_v60, 1  ;;  %v3344_v37 = vmul.f32 0.0075987587, %v6940_v35  ;;  %v7008_v60 = vmul.f32 0.036000773, %v6940_v35 }
 0x15d   : > { %5330 = vmatprep.mubr.f32.mxu0 %v6861_v22  ;;  %5358 = vmatpush3.msra.mxu1 %v5946_v54  ;;  %v7585_v22 = vld [vmem:[#allocation12_spill] sm:$0xff] }
 0x15e   : > { %5331 = vmatmul.mubr.f32.vlgmr.msra.gmra.mxu0 %v6866_v63  ;;  %5359 = vmatprep.mubr.f32.mxu1 %v7582_v57  ;;  %v3343_v57 = vmul.f32 0.0075987587, %v6936_v51  ;;  %v7004_v63 = vmul.f32 0.0075987587, %v6944_v38  ;;  %v3365_v29 = vrot.slane %v3344_v37, 1  ;;  %v3385_v56 = vadd.f32 %v3380_v25, %v7008_v60 }
 0x15f   : > { %5362 = vmatprep.subr.mxu0 %v7583_v31  ;;  %5391 = vmatprep.subr.mxu1 %v5793_v3  ;;  %v3358_v37 = vmul.f32 0.0075987587, %v3340_v14 }
 0x160   : > { %5360 = vmatmul.mubr.f32.vlgmr.msra.gmra.mxu1 %v7584_v55  ;;  %5363 = vmatpush3.msra.mxu0 %v7583_v31  ;;  %v3346_v55 = vmul.f32 0.036000773, %v6936_v51  ;;  %v3392_v31 = vsel %vm260_vm0, %v3390_v45, %v3391_v23  ;;  %v3364_v45 = vrot.slane %v3343_v57, 1  ;;  %v3429_v57 = vsel %vm310_vm1, %v3426_v61, %v3428_v18 }
 0x161   : > { %5392 = vmatpush3.msra.mxu1 %v5793_v3  ;;  %5364 = vmatprep.subr.mxu0 %v7585_v22  ;;  %v3398_v1 = vadd.f32 %v3392_v31, %v3352_v24  ;;  %v3341_v31 = vmul.f32 0.0010283802, %v6936_v51  ;;  %v3414_v24 = vrot.slane %v3385_v56, 2 }
 0x162   : > { %5393 = vmatprep.subr.mxu1 %v5795_v4  ;;  %5365 = vmatpush3.msra.mxu0 %v7585_v22  ;;  %v3394_v22 = vsel %vm260_vm0, %v3391_v23, %v3393_v20  ;;  %v3367_v23 = vrot.slane %v7004_v63, 1  ;;  %v3384_v58 = vadd.f32 %v3378_v8, %v3346_v55  ;;  %v3386_v8 = vadd.f32 %v6965_v62, %v7020_v30 }
 0x163   : > { %5394 = vmatpush3.msra.mxu1 %v5795_v4  ;;  %5366 = vmatprep.subr.mxu0 %v7586_v15  ;;  %v3399_v33 = vadd.f32 %v3394_v22, %v3353_v44  ;;  %v3400_v63 = vadd.f32 %v3393_v20, %v3354_v41  ;;  %v3342_v44 = vmul.f32 0.0010283802, %v6940_v35  ;;  %v3360_v20 = vmul.f32 0.0010283802, %v3340_v14 }
 0x164   : > { %5395 = vmatprep.subr.mxu1 %v5797_v5  ;;  %5367 = vmatpush3.msra.mxu0 %v7586_v15  ;;  %v3427_v15 = vsel %vm310_vm1, %v3425_v27, %v3426_v61  ;;  %v3359_v27 = vmul.f32 0.0010283802, %v6944_v38  ;;  %v3366_v61 = vsel %vm260_vm0, %v3364_v45, %v3365_v29  ;;  %v3368_v25 = vsel %vm260_vm0, %v3365_v29, %v3367_v23 }
 0x165   : > { %5396 = vmatpush3.msra.mxu1 %v5797_v5  ;;  %5368 = vmatprep.subr.mxu0 %v5864_v26  ;;  %v3413_v62 = vrot.slane %v3384_v58, 2  ;;  %v3433_v41 = vadd.f32 %v3427_v15, %v3398_v1  ;;  %v3434_v51 = vadd.f32 %v3429_v57, %v3399_v33  ;;  %v3405_v35 = vrot.slane %v3358_v37, 1 }
 0x166   : > { %5397 = vmatprep.subr.mxu1 %v5808_v9  ;;  %5369 = vmatpush3.msra.mxu0 %v5864_v26  ;;  %v3416_v22 = vrot.slane %v3386_v8, 2  ;;  %v3435_v38 = vadd.f32 %v3428_v18, %v3400_v63  ;;  %v3371_v55 = vadd.f32 %v3366_v61, %v3341_v31  ;;  %v3439_v45 = vrot.slane %v3342_v44, 2 }
 0x167   : > { %5398 = vmatpush3.msra.mxu1 %v5808_v9  ;;  %5370 = vmatprep.subr.mxu0 %v7510_v39  ;;  %v3440_v15 = vrot.slane %v3359_v27, 2  ;;  %v3372_v29 = vadd.f32 %v3368_v25, %v3342_v44  ;;  %v3415_v14 = vsel %vm310_vm1, %v3413_v62, %v3414_v24  ;;  %v3451_v58 = vrot.slane %v3433_v41, 4 }
 0x168   : > { %5399 = vmatprep.subr.mxu1 %v5810_v10  ;;  %5371 = vmatpush3.msra.mxu0 %v7510_v39  ;;  %v3452_v18 = vrot.slane %v3434_v51, 4  ;;  %v3406_v56 = vsel %vm260_vm0, %v3367_v23, %v3405_v35  ;;  %v3417_v1 = vsel %vm310_vm1, %v3414_v24, %v3416_v22  ;;  %v3442_v33 = vrot.slane %v3360_v20, 2  ;;  %v7589_v20 = vld [vmem:[#allocation43_spill] sm:$0xff]  ;;  %v7590_v35 = vld [vmem:[#allocation44_spill] sm:$0xff] }
 0x169   : > { %5400 = vmatpush3.msra.mxu1 %v5810_v10  ;;  %5372 = vmatprep.subr.mxu0 %v7511_v59  ;;  %v3454_v57 = vrot.slane %v3435_v38, 4  ;;  %v3408_v37 = vadd.f32 %v3368_v25, %v7008_v60  ;;  %v3420_v8 = vadd.f32 %v3415_v14, %v3371_v55  ;;  %v3441_v63 = vsel %vm310_vm1, %v3439_v45, %v3440_v15  ;;  %v7591_v38 = vld [vmem:[#allocation45_spill] sm:$0xff]  ;;  %v7593_v45 = vld [vmem:[#allocation6_spill] sm:$0xff] }
 0x16a   : > { %5401 = vmatprep.subr.mxu1 %v5812_v11  ;;  %5373 = vmatpush3.msra.mxu0 %v7511_v59  ;;  %v3453_v23 = vsel %vm349_vm2, %v3451_v58, %v3452_v18  ;;  %v3409_v31 = vadd.f32 %v3406_v56, %v7020_v30  ;;  %v3421_v44 = vadd.f32 %v3417_v1, %v3372_v29  ;;  %v7592_v55 = vld [vmem:[#allocation5_spill] sm:$0xff]  ;;  %v7595_v29 = vld [vmem:[#allocation8_spill] sm:$0xff]  ;;  %v7597_v58 = vld [vmem:[#allocation10_spill] sm:$0xff] }
 0x16b   : > { %5402 = vmatpush3.msra.mxu1 %v5812_v11  ;;  %5374 = vmatprep.subr.mxu0 %v7512_v34  ;;  %v3443_v27 = vsel %vm310_vm1, %v3440_v15, %v3442_v33  ;;  %v3455_v60 = vsel %vm349_vm2, %v3452_v18, %v3454_v57  ;;  %v3446_v61 = vadd.f32 %v3441_v63, %v3408_v37  ;;  %v7594_v15 = vld [vmem:[#allocation7_spill] sm:$0xff]  ;;  %v7596_v14 = vld [vmem:[#allocation9_spill] sm:$0xff]  ;;  %v7598_v18 = vld [vmem:[#allocation14_spill] sm:$0xff] }
 0x16c   : > { %5403 = vmatprep.subr.mxu1 %v5830_v17  ;;  %5375 = vmatpush3.msra.mxu0 %v7512_v34  ;;  %v3458_v25 = vadd.f32 %v3453_v23, %v3420_v8  ;;  %v3447_v30 = vadd.f32 %v3443_v27, %v3409_v31  ;;  %v3459_v62 = vadd.f32 %v3455_v60, %v3421_v44  ;;  %v7599_v56 = vld [vmem:[#allocation17_spill] sm:$0xff]  ;;  %v7600_v1 = vld [vmem:[#allocation26_spill] sm:$0xff]  ;;  %v7601_v33 = vld [vmem:[#allocation27_spill] sm:$0xff] }
 0x16d   : > { %5404 = vmatpush3.msra.mxu1 %v5830_v17  ;;  %5376 = vmatprep.subr.mxu0 %v7513_v6  ;;  %v7602_v57 = vld [vmem:[#allocation28_spill] sm:$0xff]  ;;  %v7603_v37 = vld [vmem:[#allocation31_spill] sm:$0xff]  ;;  %v7607_v31 = vld [vmem:[#allocation13_spill] sm:$0xff] }
 0x16e   : > { %5405 = vmatprep.subr.mxu1 %v5847_v21  ;;  %5377 = vmatpush3.msra.mxu0 %v7513_v6  ;;  %v3460_v24 = vadd.f32 %v3458_v25, %v3446_v61  ;;  %v3461_v41 = vadd.f32 %v3459_v62, %v3447_v30  ;;  %v7604_v8 = vld [vmem:[#allocation32_spill] sm:$0xff]  ;;  %v7605_v63 = vld [vmem:[#allocation11_spill] sm:$0xff] }
 0x16f   : > { %5406 = vmatpush3.msra.mxu1 %v5847_v21  ;;  %5378 = vmatprep.subr.mxu0 %v7514_v47  ;;  %v7606_v23 = vld [vmem:[#allocation12_spill] sm:$0xff] }
 0x170   : > { %5407 = vmatprep.subr.mxu1 %v5932_v48  ;;  %5379 = vmatpush3.msra.mxu0 %v7514_v47  ;;  %v3466_v51 = vsel %vm361_vm3, %v3461_v41, 0 }
 0x171   : > { %5408 = vmatpush3.msra.mxu1 %v5932_v48  ;;  %5380 = vmatprep.subr.mxu0 %v7515_v46 }
 0x172   : > { %5409 = vmatprep.subr.mxu1 %v5934_v49  ;;  %5381 = vmatpush3.msra.mxu0 %v7515_v46 }
 0x173   : > { %5410 = vmatpush3.msra.mxu1 %v5934_v49  ;;  %5382 = vmatprep.subr.mxu0 %v7516_v36 }
 0x174   : > { %5411 = vmatprep.subr.mxu1 %v5936_v50  ;;  %5383 = vmatpush3.msra.mxu0 %v7516_v36 }
 0x175   : > { %5412 = vmatpush3.msra.mxu1 %v5936_v50  ;;  %5384 = vmatprep.subr.mxu0 %v7517_v52 }
 0x176   : > { %5413 = vmatprep.subr.mxu1 %v5944_v53  ;;  %5385 = vmatpush3.msra.mxu0 %v7517_v52 }
 0x177   : > { %5414 = vmatpush3.msra.mxu1 %v5944_v53  ;;  %5386 = vmatprep.subr.mxu0 %v7519_v12 }
 0x178   : > { %5415 = vmatprep.subr.mxu1 %v5946_v54  ;;  %5387 = vmatpush3.msra.mxu0 %v7519_v12 }
 0x179   : > { %5388 = vmatprep.mubr.f32.mxu0 %v6848_v16  ;;  %5416 = vmatpush3.msra.mxu1 %v5946_v54 }
 0x17a   : > { %5389 = vmatmul.mubr.f32.vlgmr.msra.gmra.mxu0 %v6852_v19  ;;  %5417 = vmatprep.mubr.f32.mxu1 %v6848_v16  ;;  %v3463_v16 = vsel %vm361_vm3, %v3460_v24, 0 }
 0x17b   : > { %5420 = vmatprep.subr.mxu0 %v5793_v3  ;;  %5449 = vmatprep.subr.mxu1 %v7518_v2 }
 0x17c   : > { %5418 = vmatmul.mubr.f32.vlgmr.msra.gmra.mxu1 %v6852_v19  ;;  %5421 = vmatpush3.msra.mxu0 %v5793_v3  ;;  %v7106_v19 = vand.u32 4294901760, %v3466_v51 }
 0x17d   : > { %5450 = vmatpush3.msra.mxu1 %v7518_v2  ;;  %5422 = vmatprep.subr.mxu0 %v5795_v4  ;;  %v7102_v2 = vand.u32 4294901760, %v3463_v16 }
 0x17e   : > { %5451 = vmatprep.subr.mxu1 %v7520_v28  ;;  %5423 = vmatpush3.msra.mxu0 %v5795_v4 }
 0x17f   : > { %5452 = vmatpush3.msra.mxu1 %v7520_v28  ;;  %5424 = vmatprep.subr.mxu0 %v5797_v5  ;;  %v7115_v28 = vsub.f32 %v3463_v16, %v7102_v2 }
 0x180   : > { %5453 = vmatprep.subr.mxu1 %v7521_v7  ;;  %5425 = vmatpush3.msra.mxu0 %v5797_v5 }
 0x181   : > { %5454 = vmatpush3.msra.mxu1 %v7521_v7  ;;  %5426 = vmatprep.subr.mxu0 %v5808_v9  ;;  %v7120_v7 = vsub.f32 %v3466_v51, %v7106_v19 }
 0x182   : > { %5455 = vmatprep.subr.mxu1 %v7522_v32  ;;  %5427 = vmatpush3.msra.mxu0 %v5808_v9 }
 0x183   : > { %5456 = vmatpush3.msra.mxu1 %v7522_v32  ;;  %5428 = vmatprep.subr.mxu0 %v5810_v10  ;;  %v3548_v32 = vand.u32 4294901760, %v7115_v28 }
 0x184   : > { %5457 = vmatprep.subr.mxu1 %v7523_v40  ;;  %5429 = vmatpush3.msra.mxu0 %v5810_v10 }
 0x185   : > { %5458 = vmatpush3.msra.mxu1 %v7523_v40  ;;  %5430 = vmatprep.subr.mxu0 %v5812_v11  ;;  %v3558_v40 = vand.u32 4294901760, %v7120_v7 }
 0x186   : > { %5459 = vmatprep.subr.mxu1 %v7524_v0  ;;  %5431 = vmatpush3.msra.mxu0 %v5812_v11 }
 0x187   : > { %5460 = vmatpush3.msra.mxu1 %v7524_v0  ;;  %5432 = vmatprep.subr.mxu0 %v5830_v17  ;;  %v3549_v0 = vsub.f32 %v7115_v28, %v3548_v32 }
 0x188   : > { %5461 = vmatprep.subr.mxu1 %v7525_v13  ;;  %5433 = vmatpush3.msra.mxu0 %v5830_v17 }
 0x189   : > { %5462 = vmatpush3.msra.mxu1 %v7525_v13  ;;  %5434 = vmatprep.subr.mxu0 %v5847_v21  ;;  %v7588_v13 = vld [vmem:[#allocation42_spill] sm:$0xff] }
 0x18a   : > { %5463 = vmatprep.subr.mxu1 %v7526_v43  ;;  %5435 = vmatpush3.msra.mxu0 %v5847_v21 }
 0x18b   : > { %5464 = vmatpush3.msra.mxu1 %v7526_v43  ;;  %5436 = vmatprep.subr.mxu0 %v5932_v48  ;;  %v3559_v43 = vsub.f32 %v7120_v7, %v3558_v40 }
 0x18c   : > { %5465 = vmatprep.subr.mxu1 %v7527_v42  ;;  %5437 = vmatpush3.msra.mxu0 %v5932_v48 }
 0x18d   : > { %5466 = vmatpush3.msra.mxu1 %v7527_v42  ;;  %5438 = vmatprep.subr.mxu0 %v5934_v49  ;;  %v3550_v42 = vand.u32 4294901760, %v3549_v0  ;;  %v3560_v22 = vand.u32 4294901760, %v3559_v43 }
 0x18e   : > { %5467 = vmatprep.subr.mxu1 %v7588_v13  ;;  %5439 = vmatpush3.msra.mxu0 %v5934_v49 }
 0x18f   : > { %5468 = vmatpush3.msra.mxu1 %v7588_v13  ;;  %5440 = vmatprep.subr.mxu0 %v5936_v50 }
 0x190   : > { %5469 = vmatprep.subr.mxu1 %v7589_v20  ;;  %5441 = vmatpush3.msra.mxu0 %v5936_v50 }
 0x191   : > { %5470 = vmatpush3.msra.mxu1 %v7589_v20  ;;  %5442 = vmatprep.subr.mxu0 %v5944_v53 }
 0x192   : > { %5471 = vmatprep.subr.mxu1 %v7590_v35  ;;  %5443 = vmatpush3.msra.mxu0 %v5944_v53 }
 0x193   : > { %5472 = vmatpush3.msra.mxu1 %v7590_v35  ;;  %5444 = vmatprep.subr.mxu0 %v5946_v54 }
 0x194   : > { %5473 = vmatprep.subr.mxu1 %v7591_v38  ;;  %5445 = vmatpush3.msra.mxu0 %v5946_v54 }
 0x195   : > { %5446 = vmatprep.mubr.f32.mxu0 %v3550_v42  ;;  %5474 = vmatpush3.msra.mxu1 %v7591_v38 }
 0x196   : > { %5475 = vmatprep.mubr.f32.mxu1 %v7102_v2  ;;  %5447 = vmatmul.mubr.f32.vlgmr.msra.gmra.mxu0 %v3560_v22 }
 0x197   : > { %5476 = vmatmul.mubr.f32.vlgmr.msra.gmra.mxu1 %v7106_v19  ;;  %5478 = vmatprep.subr.mxu0 %v7592_v55 }
 0x198   : > { %5507 = vmatprep.subr.mxu1 %v5793_v3  ;;  %5479 = vmatpush3.msra.mxu0 %v7592_v55 }
 0x199   : > { %5508 = vmatpush3.msra.mxu1 %v5793_v3  ;;  %5480 = vmatprep.subr.mxu0 %v7593_v45 }
 0x19a   : > { %5509 = vmatprep.subr.mxu1 %v5795_v4  ;;  %5481 = vmatpush3.msra.mxu0 %v7593_v45 }
 0x19b   : > { %5510 = vmatpush3.msra.mxu1 %v5795_v4  ;;  %5482 = vmatprep.subr.mxu0 %v7594_v15 }
 0x19c   : > { %5511 = vmatprep.subr.mxu1 %v5797_v5  ;;  %5483 = vmatpush3.msra.mxu0 %v7594_v15 }
 0x19d   : > { %5512 = vmatpush3.msra.mxu1 %v5797_v5  ;;  %5484 = vmatprep.subr.mxu0 %v7595_v29 }
 0x19e   : > { %5513 = vmatprep.subr.mxu1 %v5808_v9  ;;  %5485 = vmatpush3.msra.mxu0 %v7595_v29 }
 0x19f   : > { %5514 = vmatpush3.msra.mxu1 %v5808_v9  ;;  %5486 = vmatprep.subr.mxu0 %v7596_v14 }
 0x1a0   : > { %5515 = vmatprep.subr.mxu1 %v5810_v10  ;;  %5487 = vmatpush3.msra.mxu0 %v7596_v14 }
 0x1a1   : > { %5516 = vmatpush3.msra.mxu1 %v5810_v10  ;;  %5488 = vmatprep.subr.mxu0 %v7597_v58 }
 0x1a2   : > { %5517 = vmatprep.subr.mxu1 %v5812_v11  ;;  %5489 = vmatpush3.msra.mxu0 %v7597_v58 }
 0x1a3   : > { %5518 = vmatpush3.msra.mxu1 %v5812_v11  ;;  %5490 = vmatprep.subr.mxu0 %v7598_v18 }
 0x1a4   : > { %5519 = vmatprep.subr.mxu1 %v5830_v17  ;;  %5491 = vmatpush3.msra.mxu0 %v7598_v18 }
 0x1a5   : > { %5520 = vmatpush3.msra.mxu1 %v5830_v17  ;;  %5492 = vmatprep.subr.mxu0 %v7599_v56 }
 0x1a6   : > { %5521 = vmatprep.subr.mxu1 %v5847_v21  ;;  %5493 = vmatpush3.msra.mxu0 %v7599_v56 }
 0x1a7   : > { %5522 = vmatpush3.msra.mxu1 %v5847_v21  ;;  %5494 = vmatprep.subr.mxu0 %v7600_v1 }
 0x1a8   : > { %5523 = vmatprep.subr.mxu1 %v5932_v48  ;;  %5495 = vmatpush3.msra.mxu0 %v7600_v1 }
 0x1a9   : > { %5524 = vmatpush3.msra.mxu1 %v5932_v48  ;;  %5496 = vmatprep.subr.mxu0 %v7601_v33 }
 0x1aa   : > { %5525 = vmatprep.subr.mxu1 %v5934_v49  ;;  %5497 = vmatpush3.msra.mxu0 %v7601_v33 }
 0x1ab   : > { %5526 = vmatpush3.msra.mxu1 %v5934_v49  ;;  %5498 = vmatprep.subr.mxu0 %v7602_v57 }
 0x1ac   : > { %5527 = vmatprep.subr.mxu1 %v5936_v50  ;;  %5499 = vmatpush3.msra.mxu0 %v7602_v57 }
 0x1ad   : > { %5528 = vmatpush3.msra.mxu1 %v5936_v50  ;;  %5500 = vmatprep.subr.mxu0 %v7603_v37 }
 0x1ae   : > { %5529 = vmatprep.subr.mxu1 %v5944_v53  ;;  %5501 = vmatpush3.msra.mxu0 %v7603_v37 }
 0x1af   : > { %5530 = vmatpush3.msra.mxu1 %v5944_v53  ;;  %5502 = vmatprep.subr.mxu0 %v7604_v8 }
 0x1b0   : > { %5531 = vmatprep.subr.mxu1 %v5946_v54  ;;  %5503 = vmatpush3.msra.mxu0 %v7604_v8 }
 0x1b1   : > { %5504 = vmatprep.mubr.f32.mxu0 %v7115_v28  ;;  %5532 = vmatpush3.msra.mxu1 %v5946_v54 }
 0x1b2   : > { %5505 = vmatmul.mubr.f32.vlgmr.msra.gmra.mxu0 %v7120_v7  ;;  %5533 = vmatprep.mubr.f32.mxu1 %v3548_v32 }
 0x1b3   : > { %5536 = vmatprep.subr.mxu0 %v7605_v63  ;;  %5565 = vmatprep.subr.mxu1 %v5793_v3 }
 0x1b4   : > { %5534 = vmatmul.mubr.f32.vlgmr.msra.gmra.mxu1 %v3558_v40  ;;  %5537 = vmatpush3.msra.mxu0 %v7605_v63 }
 0x1b5   : > { %5566 = vmatpush3.msra.mxu1 %v5793_v3  ;;  %5538 = vmatprep.subr.mxu0 %v7606_v23  ;;  %v4752_v3 = vpop.f32.mrf.mxu0 }
 0x1b6   : > { %5567 = vmatprep.subr.mxu1 %v5795_v4  ;;  %5539 = vmatpush3.msra.mxu0 %v7606_v23 }
 0x1b7   : > { %5568 = vmatpush3.msra.mxu1 %v5795_v4  ;;  %5540 = vmatprep.subr.mxu0 %v7607_v31  ;;  %v4781_v4 = vpop.f32.mrf.mxu1 }
 0x1b8   : > { %5569 = vmatprep.subr.mxu1 %v5797_v5  ;;  %5541 = vmatpush3.msra.mxu0 %v7607_v31  ;;  %v605_v13 = vadd.f32 %v4781_v4, %v4752_v3 }
 0x1b9   : > { %5570 = vmatpush3.msra.mxu1 %v5797_v5  ;;  %5542 = vmatprep.subr.mxu0 %v5864_v26  ;;  %v452_v5 = vpop.f32.mrf.mxu0 }
 0x1ba   : > { %5571 = vmatprep.subr.mxu1 %v5808_v9  ;;  %5543 = vmatpush3.msra.mxu0 %v5864_v26 }
 0x1bb   : > { %5572 = vmatpush3.msra.mxu1 %v5808_v9  ;;  %5544 = vmatprep.subr.mxu0 %v7510_v39  ;;  %v4810_v9 = vpop.f32.mrf.mxu0 }
 0x1bc   : > { %5573 = vmatprep.subr.mxu1 %v5810_v10  ;;  %5545 = vmatpush3.msra.mxu0 %v7510_v39  ;;  %v710_v38 = vadd.f32 %v4810_v9, %v605_v13 }
 0x1bd   : > { %5574 = vmatpush3.msra.mxu1 %v5810_v10  ;;  %5546 = vmatprep.subr.mxu0 %v7511_v59  ;;  %v598_v10 = vpop.f32.mrf.mxu1 }
 0x1be   : > { %5575 = vmatprep.subr.mxu1 %v5812_v11  ;;  %5547 = vmatpush3.msra.mxu0 %v7511_v59  ;;  %v599_v22 = vadd.f32 %v598_v10, %v452_v5 }
 0x1bf   : > { %5576 = vmatpush3.msra.mxu1 %v5812_v11  ;;  %5548 = vmatprep.subr.mxu0 %v7512_v34  ;;  %v4839_v11 = vpop.f32.mrf.mxu1 }
 0x1c0   : > { %5577 = vmatprep.subr.mxu1 %v5830_v17  ;;  %5549 = vmatpush3.msra.mxu0 %v7512_v34  ;;  %v804_v8 = vadd.f32 %v4839_v11, %v710_v38 }
 0x1c1   : > { %5578 = vmatpush3.msra.mxu1 %v5830_v17  ;;  %5550 = vmatprep.subr.mxu0 %v7513_v6  ;;  %v702_v17 = vpop.f32.mrf.mxu0  ;;  %v795_v26 = vpop.f32.mrf.mxu1 }
 0x1c2   : > { %5579 = vmatprep.subr.mxu1 %v5847_v21  ;;  %5551 = vmatpush3.msra.mxu0 %v7513_v6  ;;  %v703_v18 = vadd.f32 %v702_v17, %v599_v22 }
 0x1c3   : > { %5580 = vmatpush3.msra.mxu1 %v5847_v21  ;;  %5552 = vmatprep.subr.mxu0 %v7514_v47  ;;  %v4868_v21 = vpop.f32.mrf.mxu0 }
 0x1c4   : > { %5581 = vmatprep.subr.mxu1 %v5932_v48  ;;  %5553 = vmatpush3.msra.mxu0 %v7514_v47  ;;  %v796_v5 = vadd.f32 %v795_v26, %v703_v18  ;;  %v920_v9 = vadd.f32 %v4868_v21, %v804_v8 }
 0x1c5   : > { %5582 = vmatpush3.msra.mxu1 %v5932_v48  ;;  %5554 = vmatprep.subr.mxu0 %v7515_v46  ;;  %v7275_v48 = vpop.f32.mrf.mxu1 }
 0x1c6   : > { %5583 = vmatprep.subr.mxu1 %v5934_v49  ;;  %5555 = vmatpush3.msra.mxu0 %v7515_v46 }
 0x1c7   : > { %5584 = vmatpush3.msra.mxu1 %v5934_v49  ;;  %5556 = vmatprep.subr.mxu0 %v7516_v36  ;;  %v7277_v49 = vpop.f32.mrf.mxu0 }
 0x1c8   : > { %5585 = vmatprep.subr.mxu1 %v5936_v50  ;;  %5557 = vmatpush3.msra.mxu0 %v7516_v36  ;;  %v914_v17 = vadd.f32 %v7277_v49, %v796_v5 }
 0x1c9   : > { %5586 = vmatpush3.msra.mxu1 %v5936_v50  ;;  %5558 = vmatprep.subr.mxu0 %v7517_v52  ;;  %v4926_v50 = vpop.f32.mrf.mxu0 }
 0x1ca   : > { %5587 = vmatprep.subr.mxu1 %v5944_v53  ;;  %5559 = vmatpush3.msra.mxu0 %v7517_v52 }
 0x1cb   : > { %5588 = vmatpush3.msra.mxu1 %v5944_v53  ;;  %5560 = vmatprep.subr.mxu0 %v7519_v12  ;;  %v7279_v53 = vpop.f32.mrf.mxu1  ;;  %v1224_v39 = vpop.f32.mrf.mxu0 }
 0x1cc   : > { %5589 = vmatprep.subr.mxu1 %v5946_v54  ;;  %5561 = vmatpush3.msra.mxu0 %v7519_v12  ;;  %v1004_v21 = vadd.f32 %v7279_v53, %v914_v17 }
 0x1cd   : > { %5562 = vmatprep.mubr.f32.mxu0 %v7102_v2  ;;  %5590 = vmatpush3.msra.mxu1 %v5946_v54  ;;  %v4955_v54 = vpop.f32.mrf.mxu1  ;;  %v4984_v59 = vpop.f32.mrf.mxu0 }
 0x1ce   : > { %5591 = vmatprep.mubr.f32.mxu1 %v7102_v2  ;;  %5563 = vmatmul.mubr.f32.vlgmr.msra.gmra.mxu0 %v7106_v19  ;;  %v1377_v0 = vadd.f32 %v4955_v54, %v4926_v50 }
 0x1cf   : > { %5592 = vmatmul.mubr.f32.vlgmr.msra.gmra.mxu1 %v7106_v19  ;;  %v1370_v34 = vpop.f32.mrf.mxu1  ;;  %v1474_v47 = vpop.f32.mrf.mxu0 }
 0x1d0   : > { %v1371_v20 = vadd.f32 %v1370_v34, %v1224_v39  ;;  %v1482_v42 = vadd.f32 %v4984_v59, %v1377_v0 }
 0x1d1   : > { %v5013_v6 = vpop.f32.mrf.mxu1  ;;  %v5042_v46 = vpop.f32.mrf.mxu0 }
 0x1d2   : > { %v1475_v15 = vadd.f32 %v1474_v47, %v1371_v20  ;;  %v1576_v1 = vadd.f32 %v5013_v6, %v1482_v42 }
 0x1d3   : > { %v1567_v36 = vpop.f32.mrf.mxu1  ;;  %v1685_v12 = vpop.f32.mrf.mxu0 }
 0x1d4   : > { %v1568_v23 = vadd.f32 %v1567_v36, %v1475_v15  ;;  %v1692_v31 = vadd.f32 %v5042_v46, %v1576_v1  ;;  %v1010_v36 = vadd.f32 %v7275_v48, %v920_v9 }
 0x1d5   : > { %v5071_v52 = vpop.f32.mrf.mxu1  ;;  %v5100_v44 = vpop.f32.mrf.mxu0 }
 0x1d6   : > { %v1686_v54 = vadd.f32 %v1685_v12, %v1568_v23  ;;  %v1782_v6 = vadd.f32 %v5071_v52, %v1692_v31  ;;  %v4113_v52 = vmul.f32 %v1004_v21, %v1004_v21 }
 0x1d7   : > { %v1775_v27 = vpop.f32.mrf.mxu1  ;;  %v2000_v61 = vpop.f32.mrf.mxu0 }
 0x1d8   : > { %v1776_v46 = vadd.f32 %v1775_v27, %v1686_v54  ;;  %v4116_v26 = vmul.f32 %v1782_v6, %v1782_v6  ;;  %v4118_v1 = vmul.f32 %v1782_v6, %v1010_v36 }
 0x1d9   : > { %v5129_v60 = vpop.f32.mrf.mxu1  ;;  %v5158_v25 = vpop.f32.mrf.mxu0 }
 0x1da   : > { %v2153_v29 = vadd.f32 %v5129_v60, %v5100_v44 }
 0x1db   : > { %v2146_v30 = vpop.f32.mrf.mxu1  ;;  %v2250_v24 = vpop.f32.mrf.mxu0 }
 0x1dc   : > { %v2147_v33 = vadd.f32 %v2146_v30, %v2000_v61  ;;  %v2258_v57 = vadd.f32 %v5158_v25, %v2153_v29 }
 0x1dd   : > { %v5187_v62 = vpop.f32.mrf.mxu1 }
 0x1de   : > { %v2251_v3 = vadd.f32 %v2250_v24, %v2147_v33  ;;  %v2352_v39 = vadd.f32 %v5187_v62, %v2258_v57  ;;  %v4114_v62 = vmul.f32 %v1010_v36, %v1010_v36  ;;  %v4115_v24 = vmul.f32 %v1776_v46, %v1776_v46 }
 0x1df   : > { %v2343_v16 = vpop.f32.mrf.mxu1 }
 0x1e0   : > { %v2344_v47 = vadd.f32 %v2343_v16, %v2251_v3  ;;  %v4136_v27 = vadd.f32 %v4116_v26, %v4114_v62 }
 0x1e6   : > { %v5216_v41 = vpop.f32.mrf.mxu0 }
 0x1e7   : > { %v2468_v44 = vadd.f32 %v5216_v41, %v2352_v39 }
 0x1e8   : > { %v5245_v51 = vpop.f32.mrf.mxu1  ;;  %v2461_v2 = vpop.f32.mrf.mxu0 }
 0x1e9   : > { %v2462_v61 = vadd.f32 %v2461_v2, %v2344_v47  ;;  %v2558_v30 = vadd.f32 %v5245_v51, %v2468_v44  ;;  %v4138_v51 = vadd.f32 0.0001, %v4136_v27 }
 0x1ea   : > { %v2551_v28 = vpop.f32.mrf.mxu1 }
 0x1eb   : > { %v4120_v16 = vsub.f32 %v2558_v30, %v4114_v62 }
 0x202   : > { %v5274_v19 = vpop.f32.mrf.mxu0 }
 0x203   : > { %v5303_v7 = vpop.f32.mrf.mxu1 }
 0x204   : > { %v2776_v32 = vpop.f32.mrf.mxu0  ;;  %v2929_v35 = vadd.f32 %v5303_v7, %v5274_v19  ;;  %v2552_v19 = vadd.f32 %v2551_v28, %v2462_v61 }
 0x205   : > { %v2922_v43 = vpop.f32.mrf.mxu1 }
 0x206   : > { %v2923_v14 = vadd.f32 %v2922_v43, %v2776_v32  ;;  %v4119_v32 = vsub.f32 %v2552_v19, %v4113_v52  ;;  %v4135_v43 = vadd.f32 %v4115_v24, %v4113_v52 }
 0x208   : > { %v4137_v38 = vadd.f32 0.0001, %v4135_v43 }
 0x21e   : > { %v5332_v40 = vpop.f32.mrf.mxu0 }
 0x21f   : > { %v3034_v58 = vadd.f32 %v5332_v40, %v2929_v35 }
 0x220   : > { %v5361_v55 = vpop.f32.mrf.mxu1  ;;  %v3026_v45 = vpop.f32.mrf.mxu0 }
 0x221   : > { %v3027_v37 = vadd.f32 %v3026_v45, %v2923_v14  ;;  %v3128_v4 = vadd.f32 %v5361_v55, %v3034_v58 }
 0x222   : > { %v3119_v63 = vpop.f32.mrf.mxu1 }
 0x223   : > { %v3120_v59 = vadd.f32 %v3119_v63, %v3027_v37  ;;  %v4117_v63 = vmul.f32 %v1776_v46, %v1004_v21 }
 0x23a   : > { %v5390_v56 = vpop.f32.mrf.mxu0 }
 0x23b   : > { %v3244_v34 = vadd.f32 %v5390_v56, %v3128_v4  ;;  %v4126_v4 = vmul.f32 2.0, %v4118_v1 }
 0x23c   : > { %v5419_v10 = vpop.f32.mrf.mxu1  ;;  %v3237_v50 = vpop.f32.mrf.mxu0 }
 0x23d   : > { %v3238_v60 = vadd.f32 %v3237_v50, %v3120_v59  ;;  %v3334_v25 = vadd.f32 %v5419_v10, %v3244_v34  ;;  %v4125_v10 = vmul.f32 2.0, %v4117_v63  ;;  %v4128_v39 = vadd.f32 0.0001, %v4126_v4 }
 0x23e   : > { %v3327_v11 = vpop.f32.mrf.mxu1 }
 0x23f   : > { %v3328_v12 = vadd.f32 %v3327_v11, %v3238_v60  ;;  %v4122_v7 = vsub.f32 %v3334_v25, %v4116_v26  ;;  %v4127_v17 = vadd.f32 0.0001, %v4125_v10  ;;  %v4267_v60 = vld [vmem:[%s7330_s3] ss:$0 sm:$0xff] }
 0x241   : > { %v4121_v41 = vsub.f32 %v3328_v12, %v4115_v24  ;;  %v4140_v40 = vadd.f32 %v4122_v7, %v4120_v16 }
 0x243   : > { %v4139_v2 = vadd.f32 %v4121_v41, %v4119_v32  ;;  %v4142_v53 = vadd.f32 0.0009, %v4140_v40 }
 0x245   : > { %v4141_v42 = vadd.f32 0.0009, %v4139_v2  ;;  %v4144_v55 = vmul.f32 %v4142_v53, %v4138_v51 }
 0x247   : > { %v4143_v29 = vmul.f32 %v4141_v42, %v4137_v38  ;;  %5635 = vrcp.f32 %v4144_v55 }
 0x249   : > { %5637 = vrcp.f32 %v4143_v29 }
 0x254   : > { %v5636_v44 = vpop.eup %5635 }
 0x256   : > { %v5448_v49 = vpop.f32.mrf.mxu0  ;;  %v5638_v46 = vpop.eup %5637 }
 0x257   : > { %v5477_v0 = vpop.f32.mrf.mxu1 }
 0x258   : > { %v3552_v48 = vpop.f32.mrf.mxu0  ;;  %v3705_v35 = vadd.f32 %v5477_v0, %v5448_v49 }
 0x259   : > { %v3698_v20 = vpop.f32.mrf.mxu1 }
 0x25a   : > { %v3699_v45 = vadd.f32 %v3698_v20, %v3552_v48 }
 0x272   : > { %v5506_v13 = vpop.f32.mrf.mxu0 }
 0x273   : > { %v3810_v15 = vadd.f32 %v5506_v13, %v3705_v35 }
 0x274   : > { %v5535_v22 = vpop.f32.mrf.mxu1  ;;  %v3802_v28 = vpop.f32.mrf.mxu0 }
 0x275   : > { %v3803_v14 = vadd.f32 %v3802_v28, %v3699_v45  ;;  %v3904_v18 = vadd.f32 %v5535_v22, %v3810_v15 }
 0x276   : > { %v3895_v58 = vpop.f32.mrf.mxu1 }
 0x277   : > { %v3896_v33 = vadd.f32 %v3895_v58, %v3803_v14 }
 0x28e   : > { %v5564_v56 = vpop.f32.mrf.mxu0 }
 0x28f   : > { %v4020_v57 = vadd.f32 %v5564_v56, %v3904_v18  ;;  %v5593_v37 = vpop.f32.mrf.mxu1 }
 0x290   : > { %v4013_v8 = vpop.f32.mrf.mxu0 }
 0x291   : > { %v4110_v23 = vadd.f32 %v5593_v37, %v4020_v57  ;;  %v4014_v31 = vadd.f32 %v4013_v8, %v3896_v33  ;;  %v4103_v3 = vpop.f32.mrf.mxu1 }
 0x293   : > { %v4124_v5 = vsub.f32 %v4110_v23, %v4118_v1  ;;  %v4104_v9 = vadd.f32 %v4103_v3, %v4014_v31 }
 0x295   : > { %v4130_v50 = vmul.f32 2.0, %v4124_v5  ;;  %v4123_v54 = vsub.f32 %v4104_v9, %v4117_v63 }
 0x297   : > { %v4132_v59 = vadd.f32 0.0009, %v4130_v50  ;;  %v4129_v34 = vmul.f32 2.0, %v4123_v54 }
 0x299   : > { %v4134_v6 = vmul.f32 %v4132_v59, %v4128_v39  ;;  %v4131_v47 = vadd.f32 0.0009, %v4129_v34 }
 0x29b   : > { %v4133_v11 = vmul.f32 %v4131_v47, %v4127_v17  ;;  %v4148_v36 = vmul.f32 %v5636_v44, %v4134_v6 }
 0x29d   : > { %v4147_v61 = vmul.f32 %v5638_v46, %v4133_v11  ;;  %v4157_v25 = vmul.f32 %v4267_v60, %v4148_v36 }
 0x29f   : > { %v4156_v21 = vmul.f32 %v4267_v60, %v4147_v61  ;;  %v4160_v30 = vsel %vm4158_vm4, %v4157_v25, 0.0 }
 0x2a1   : > { %v4159_v26 = vsel %vm4158_vm4, %v4156_v21, 0.0 }
 0x2a2   : > { %v4161_v12 = vadd.f32 %v4160_v30, %v4159_v26 }
 0x2a4   : > { %4162 = vadd.xlane.f32.xlu0 %v4161_v12 }
 0x32d   : > { %v4163_v62 = vpop.xlane.xlu0 %4162 }
 0x32e   : > { %v4164_v24 = vrot.slane %v4163_v62, 4 }
 0x330   : > { %v4165_v19 = vadd.f32 %v4164_v24, %v4163_v62 }
 0x332   : > { %v4166_v7 = vrot.slane %v4165_v19, 2 }
 0x334   : > { %v4167_v49 = vadd.f32 %v4166_v7, %v4165_v19 }
 0x336   : > { %v4168_v52 = vrot.slane %v4167_v49, 1 }
 0x338   : > { %v4169_v16 = vadd.f32 %v4168_v52, %v4167_v49 }
 0x33a   : > { %5594 = vpush %v4169_v16 }
 0x36b   : > { %s5595_s8 = spop %5594 }
 0x36c   : > { %v4171_v41 = vstv %s5595_s8 }
 0x36d   : > { %4172 = vst [vmem:[%s205_s5] sm:$0xff] %v4171_v41 }
 0x36e   : > { %5660 = shalt.err (!%p5657_p3)
}
 0x36f   : > { %s5661_s22 = scalar_lea.hbm %s4185_s11, 128  ;;  %s5665_s27 = scalar_lea.hbm %s7331_s4, 256 }
 0x370   : > { %p5662_p4 = scmp.ne.s32.totalorder %s4185_s11, %s5661_s22  ;;  %p5666_p9 = scmp.lt.s32.totalorder %s4185_s11, %s7331_s4 }
 0x371   : > { %p5667_p10 = scmp.lt.s32.totalorder %s5665_s27, %s5661_s22 }
 0x372   : > { %p5663_p7 = pnand %p5662_p4, %p5773_p5 }
 0x373   : > { %p5668_p11 = por %p5667_p10, %p5666_p9 }
 0x374   : > { %p5664_p8 = pneg %p5663_p7 }
 0x376   : > { %p5669_p12 = pnand %p5668_p11, %p5664_p8 }
 0x378   : > { %5672 = shalt.err (!%p5669_p12)
}
 0x379   : > { %5596 = dma.vmem_to_hbm [thread:$0]  (%p5773_p5), %s7289_s6, 128, %s4185_s11, %s4174_s12  }
 0x37a PF: > { %p5602_p13 = scmp.ge.s32.totalorder %s5707_s18, 2  ;;  %s4199_s5 = sand.u32 1, %s5695_s15  }
 0x37b   : > { %s4200_s7 = scalar_lea.sflag [#allocation3], %s4199_s5 }
 0x37c   : > { %p5599_p0 = pnand %p5602_p13, %p5777_p6 }
 0x37e   : > { %p5600_p1 = pneg %p5599_p0 }
 0x380   : > { %5690 = dma.done.wait (%p5600_p1), %s4200_s7, 128  }
 0x381   : > { %5692 = vsyncadd (%p5600_p1), %s4200_s7, 4294967168  ;;  %p14_p2 = scmp.ge.s32.totalorder %s5760_s21, 4   ;;  %s7608_s15 = smov %s5699_s16 }
 0x382   : > { %s7609_s16 = smov %s5703_s17  ;;  %s7610_s17 = smov %s5771_s24 }
 0x383   : > { %s7611_s18 = smov %s5760_s21  ;;  %16 = sbr.rel (!%p14_p2) target bundleno = 3 (0x3), region = 74 }
 0x388   :  { %4205 = vsyncpa [#allocation3], 1 }
 0x389   :  { %4207 = vsyncpa [#allocation3 + $0x1], 1 }

</bundles_post_ra>
